<compile_context>
chip_gen: v6e
topology: v6e:2x2x1
jax: 0.10.0
libtpu: 0.0.40
codegen_flags: <defaults>
</compile_context>

<pallas_src>
import math

import jax
import jax.numpy as jnp
from jax.experimental import pallas as pl
from jax.experimental.pallas import tpu as pltpu


# -----------------------------------------------------------------------------
# Kernel
# -----------------------------------------------------------------------------
def make_fused_bilstm_kernel(T, B, H, n_layers):
    """Fused bi-LSTM stack + last-timestep Linear + sigmoid, all in one kernel body."""
    G = 8 * H       # gate lanes per fused step: [i_f i_b | f_f f_b | g_f g_b | o_f o_b]
    H2 = 2 * H      # fused state width: [h_f | h_b]

    def kernel(*refs):
        idx = 0
        x_ref = refs[idx]; idx += 1                      # (T*B, I) time-major flattened
        gscale_ref = refs[idx]; idx += 1                 # (1, G)
        gshift_ref = refs[idx]; idx += 1                 # (1, G)
        dmask_ref = refs[idx]; idx += 1                  # (1, G) 1.0 on fwd gate lanes
        layer_refs = []
        for l in range(n_layers):
            n = 3 if l == 0 else 4
            layer_refs.append(refs[idx:idx + n])
            idx += n
        fcf_ref, fcb_ref, fcbias_ref = refs[idx:idx + 3]; idx += 3
        out_ref = refs[idx]; idx += 1                    # (B, 1)
        hsf_ref, hsb_ref = refs[idx], refs[idx + 1]      # (T*B, 2H) VMEM scratches

        # Hoisted loop-invariants (built once per call, never per step).
        g_scale = gscale_ref[...]            # 0.5 on i/f/o lanes, 1.0 on g lanes
        g_shift = gshift_ref[...]            # 0.5 on i/f/o lanes, 0.0 on g lanes
        m_fwd = dmask_ref[...]
        m_bwd = 1.0 - m_fwd

        h_last = None
        h_first = None
        for l in range(n_layers):
            is_last = l == n_layers - 1
            if l == 0:
                w_ih, w_hh, bias = (r[...] for r in layer_refs[0])
                # Hoisted time-independent input projection: one tall matmul.
                xp = jnp.dot(x_ref[...], w_ih, preferred_element_type=jnp.float32) + bias
            else:
                w_f, w_b, w_hh, bias = (r[...] for r in layer_refs[l])
                # Previous-layer outputs live in the scratches (fwd-/bwd-time-ordered);
                # zero-row-padded weights pick the right half -> no per-timestep concats.
                xp = (jnp.dot(hsf_ref[...], w_f, preferred_element_type=jnp.float32)
                      + jnp.dot(hsb_ref[...], w_b, preferred_element_type=jnp.float32)
                      + bias)
            # Step-order the gate inputs once (off the recurrence chain): at fused step s
            # the fwd lanes need xp(t=s) and the bwd lanes need xp(t=T-1-s).
            xp_rev = jnp.concatenate(
                [xp[(T - 1 - t) * B:(T - t) * B, :] for t in range(T)], axis=0)
            xp_step = xp * m_fwd + xp_rev * m_bwd                       # (T*B, G)

            h = jnp.zeros((B, H2), jnp.float32)                         # [h_f | h_b]
            c = jnp.zeros((B, H2), jnp.float32)                         # [c_f | c_b]
            for s in range(T):
                # Single block-diagonal recurrent dot drives both directions at once.
                gates = xp_step[s * B:(s + 1) * B, :] + jnp.dot(
                    h, w_hh, preferred_element_type=jnp.float32)        # (B, G)
                # One tanh pass; hoisted affine turns i/f/o lanes into sigmoid(pre).
                a = jnp.tanh(gates) * g_scale + g_shift
                i_g = a[:, 0 * H2:1 * H2]
                f_g = a[:, 1 * H2:2 * H2]
                g_g = a[:, 2 * H2:3 * H2]
                o_g = a[:, 3 * H2:4 * H2]
                c = f_g * c + i_g * g_g
                h = o_g * jnp.tanh(c)
                if is_last:
                    if s == 0:
                        h_first = h   # bwd half == bwd hidden at original t = T-1
                else:
                    # Stash outputs at static row offsets (writes are off the chain):
                    # hsf is fwd-time-ordered, hsb is bwd-time-ordered.
                    hsf_ref[s * B:(s + 1) * B, :] = h
                    hsb_ref[(T - 1 - s) * B:(T - s) * B, :] = h
            h_last = h                # fwd half == fwd hidden at t = T-1

        # fc(out[:, -1, :]) == h_f(T-1) @ fc_w[:H] + h_b(T-1) @ fc_w[H:] + b, realized
        # with zero-row-padded fc halves so no lane slicing / concat is needed.
        logits = (jnp.dot(h_last, fcf_ref[...], preferred_element_type=jnp.float32)
                  + jnp.dot(h_first, fcb_ref[...], preferred_element_type=jnp.float32)
                  + fcbias_ref[...])                                    # (B, 1)
        out_ref[...] = jax.nn.sigmoid(logits)

    return kernel


# -----------------------------------------------------------------------------
# Wrappers
# -----------------------------------------------------------------------------
def _full_spec(shape):
    """Whole-array VMEM block (block == full array, grid-less call)."""
    return pl.BlockSpec(shape, lambda: (0,) * len(shape))


def lstm_forward(x, prepared, n_layers, hidden_dim):
    """Mirrors LSTM.forward: bi-LSTM stack -> Linear(out[:, -1, :]) -> sigmoid -> squeeze."""
    B, T, I = x.shape
    H = hidden_dim
    # Single batch-first -> time-major transpose + flatten, once, outside the kernel.
    x_flat = jnp.transpose(x, (1, 0, 2)).reshape(T * B, I)

    args = [x_flat, prepared['gate_scale'], prepared['gate_shift'], prepared['dir_mask']]
    for lp in prepared['layers']:
        args.extend(lp)
    args.extend([prepared['fc_w_fwd'], prepared['fc_w_bwd'], prepared['fc_b']])

    out = pl.pallas_call(
        make_fused_bilstm_kernel(T, B, H, n_layers),
        out_shape=jax.ShapeDtypeStruct((B, 1), jnp.float32),
        in_specs=[_full_spec(a.shape) for a in args],
        out_specs=_full_spec((B, 1)),
        scratch_shapes=[pltpu.VMEM((T * B, 2 * H), jnp.float32),   # fwd-time-ordered h
                        pltpu.VMEM((T * B, 2 * H), jnp.float32)],  # bwd-time-ordered h
    )(*args)
    return jnp.squeeze(out)                                        # (B,)


# -----------------------------------------------------------------------------
# Parameter init (PyTorch layouts) + host-side kernel-layout preparation
# -----------------------------------------------------------------------------
def init_params(key, input_dim, hidden_dim, n_layers):
    """nn.LSTM / nn.Linear-style uniform(-1/sqrt(fan), 1/sqrt(fan)) init, PyTorch layouts."""
    k = 1.0 / math.sqrt(hidden_dim)
    raw_layers = []
    for layer in range(n_layers):
        in_dim = input_dim if layer == 0 else 2 * hidden_dim
        dirs = {}
        for direction in ('fwd', 'bwd'):
            key, k1, k2, k3, k4 = jax.random.split(key, 5)
            w_ih = jax.random.uniform(k1, (4 * hidden_dim, in_dim), jnp.float32, -k, k)
            w_hh = jax.random.uniform(k2, (4 * hidden_dim, hidden_dim), jnp.float32, -k, k)
            b_ih = jax.random.uniform(k3, (4 * hidden_dim,), jnp.float32, -k, k)
            b_hh = jax.random.uniform(k4, (4 * hidden_dim,), jnp.float32, -k, k)
            dirs[direction] = (w_ih, w_hh, b_ih + b_hh)   # fuse the two biases
        raw_layers.append(dirs)
    kf = 1.0 / math.sqrt(2 * hidden_dim)
    key, k1, k2 = jax.random.split(key, 3)
    fc_w = jax.random.uniform(k1, (1, 2 * hidden_dim), jnp.float32, -kf, kf)
    fc_b = jax.random.uniform(k2, (1,), jnp.float32, -kf, kf)
    return raw_layers, fc_w, fc_b


def prepare_params(raw_layers, fc_w, fc_b, hidden_dim):
    """Host-side weight prep: gate-column interleave, 0.5 pre-scale folding (sigmoid via
    tanh), block-diagonal recurrent weights, zero-row-padded layer-boundary / FC weights."""
    H = hidden_dim
    G = 8 * H

    # Gate-column layout per fused step: [i_f i_b | f_f f_b | g_f g_b | o_f o_b].
    ones_h = jnp.ones((H,), jnp.float32)
    col_scale = jnp.concatenate([ones_h * 0.5] * 4 + [ones_h] * 2 + [ones_h * 0.5] * 2)
    gate_scale = col_scale[None, :]                                     # (1, G)
    gate_shift = jnp.where(col_scale < 1.0, 0.5, 0.0)[None, :]          # (1, G)
    dir_mask = jnp.tile(jnp.concatenate([ones_h, ones_h * 0.0]), 4)[None, :]  # fwd lanes

    def interleave_cols(wf_t, wb_t):
        # (rows, 4H) fwd / bwd (W^T, PyTorch gate order i,f,g,o) -> (rows, 8H) interleaved.
        blocks = []
        for g in range(4):
            blocks.append(wf_t[:, g * H:(g + 1) * H])
            blocks.append(wb_t[:, g * H:(g + 1) * H])
        return jnp.concatenate(blocks, axis=1)

    layers = []
    for l, dirs in enumerate(raw_layers):
        w_ih_f, w_hh_f, b_f = dirs['fwd']
        w_ih_b, w_hh_b, b_b = dirs['bwd']
        w_ih = interleave_cols(w_ih_f.T, w_ih_b.T) * col_scale[None, :]          # (in, G)
        bias = interleave_cols(b_f[None, :], b_b[None, :]) * col_scale[None, :]  # (1, G)
        # Block-diagonal recurrent weight: fwd gate columns read only h_f rows, bwd
        # columns only h_b rows -> a single (B,2H)x(2H,8H) dot per fused step.
        zer = jnp.zeros((H, H), jnp.float32)
        wfT, wbT = w_hh_f.T, w_hh_b.T
        blocks = []
        for g in range(4):
            blocks.append(jnp.concatenate([wfT[:, g * H:(g + 1) * H], zer], axis=0))
            blocks.append(jnp.concatenate([zer, wbT[:, g * H:(g + 1) * H]], axis=0))
        w_hh = jnp.concatenate(blocks, axis=1) * col_scale[None, :]               # (2H, G)
        if l == 0:
            layers.append((w_ih, w_hh, bias))
        else:
            # Split by input-feature rows and zero-pad so the fwd-time-ordered scratch
            # and the bwd-time-ordered scratch each drive only their own half.
            zpad = jnp.zeros((H, G), jnp.float32)
            w_from_fwd = jnp.concatenate([w_ih[:H, :], zpad], axis=0)             # (2H, G)
            w_from_bwd = jnp.concatenate([zpad, w_ih[H:, :]], axis=0)             # (2H, G)
            layers.append((w_from_fwd, w_from_bwd, w_hh, bias))

    fc_t = fc_w.T                                                                  # (2H, 1)
    zpad1 = jnp.zeros((H, 1), jnp.float32)
    fc_w_fwd = jnp.concatenate([fc_t[:H, :], zpad1], axis=0)                       # (2H, 1)
    fc_w_bwd = jnp.concatenate([zpad1, fc_t[H:, :]], axis=0)                       # (2H, 1)
    return {'gate_scale': gate_scale, 'gate_shift': gate_shift, 'dir_mask': dir_mask,
            'layers': layers, 'fc_w_fwd': fc_w_fwd, 'fc_w_bwd': fc_w_bwd,
            'fc_b': fc_b[None, :]}


# -----------------------------------------------------------------------------
# Pure-JAX reference (eval-mode nn.LSTM semantics) for correctness checking
# -----------------------------------------------------------------------------
def lstm_reference(x, raw_layers, fc_w, fc_b, hidden_dim):
    H = hidden_dim
    B, T, _ = x.shape

    def cell(xt, h, c, w_ih, w_hh, b):
        gates = xt @ w_ih.T + h @ w_hh.T + b
        i = jax.nn.sigmoid(gates[:, 0:H])
        f = jax.nn.sigmoid(gates[:, H:2 * H])
        g = jnp.tanh(gates[:, 2 * H:3 * H])
        o = jax.nn.sigmoid(gates[:, 3 * H:4 * H])
        c = f * c + i * g
        return o * jnp.tanh(c), c

    seq = x
    for dirs in raw_layers:
        outs_f, outs_b = [], [None] * T
        h = jnp.zeros((B, H), jnp.float32); c = jnp.zeros((B, H), jnp.float32)
        w_ih, w_hh, b = dirs['fwd']
        for t in range(T):
            h, c = cell(seq[:, t, :], h, c, w_ih, w_hh, b)
            outs_f.append(h)
        h = jnp.zeros((B, H), jnp.float32); c = jnp.zeros((B, H), jnp.float32)
        w_ih, w_hh, b = dirs['bwd']
        for t in range(T - 1, -1, -1):
            h, c = cell(seq[:, t, :], h, c, w_ih, w_hh, b)
            outs_b[t] = h
        seq = jnp.stack([jnp.concatenate([outs_f[t], outs_b[t]], axis=-1)
                         for t in range(T)], axis=1)
    last = seq[:, -1, :]
    return jnp.squeeze(jax.nn.sigmoid(last @ fc_w.T + fc_b))


# -----------------------------------------------------------------------------
# Main
# -----------------------------------------------------------------------------
if __name__ == "__main__":
    B, T, INPUT_DIM = 2, 8, 16
    HIDDEN_DIM, N_LAYERS = 32, 2

    key = jax.random.PRNGKey(0)
    key, kx, kp = jax.random.split(key, 3)
    x = jax.random.normal(kx, (B, T, INPUT_DIM), dtype=jnp.float32)
    raw_layers, fc_w, fc_b = init_params(kp, INPUT_DIM, HIDDEN_DIM, N_LAYERS)
    prepared = prepare_params(raw_layers, fc_w, fc_b, HIDDEN_DIM)

    fwd = jax.jit(lambda xx: lstm_forward(xx, prepared, N_LAYERS, HIDDEN_DIM))
    out = jax.block_until_ready(fwd(x))

    ref = jax.block_until_ready(lstm_reference(x, raw_layers, fc_w, fc_b, HIDDEN_DIM))

    assert out.shape == (B,)
    assert bool(jnp.all(jnp.isfinite(out)))
    assert bool(jnp.max(jnp.abs(out - ref)) < 2e-2), (out, ref)
    print("KERNEL_OK")
</pallas_src>

<mosaic_0001>
module attributes {stable_mosaic.version = 11 : i64} {
  func.func @kernel(%arg0: memref<16x16xf32, #tpu.memory_space<vmem>>, %arg1: memref<1x256xf32, #tpu.memory_space<vmem>>, %arg2: memref<1x256xf32, #tpu.memory_space<vmem>>, %arg3: memref<1x256xf32, #tpu.memory_space<vmem>>, %arg4: memref<16x256xf32, #tpu.memory_space<vmem>>, %arg5: memref<64x256xf32, #tpu.memory_space<vmem>>, %arg6: memref<1x256xf32, #tpu.memory_space<vmem>>, %arg7: memref<64x256xf32, #tpu.memory_space<vmem>>, %arg8: memref<64x256xf32, #tpu.memory_space<vmem>>, %arg9: memref<64x256xf32, #tpu.memory_space<vmem>>, %arg10: memref<1x256xf32, #tpu.memory_space<vmem>>, %arg11: memref<64x1xf32, #tpu.memory_space<vmem>>, %arg12: memref<64x1xf32, #tpu.memory_space<vmem>>, %arg13: memref<1x1xf32, #tpu.memory_space<vmem>>, %arg14: memref<2x1xf32, #tpu.memory_space<vmem>>, %arg15: memref<16x64xf32, #tpu.memory_space<vmem>>, %arg16: memref<16x64xf32, #tpu.memory_space<vmem>>) attributes {dimension_semantics = [], scalar_prefetch = 0 : i64, scratch_operands = 2 : i64, tpu.core_type = #tpu.core_type<tc>} {
    %c0 = arith.constant 0 : index
    %c0_0 = arith.constant 0 : index
    %0 = vector.load %arg1[%c0, %c0_0] : memref<1x256xf32, #tpu.memory_space<vmem>>, vector<1x256xf32>
    %c0_1 = arith.constant 0 : index
    %c0_2 = arith.constant 0 : index
    %1 = vector.load %arg2[%c0_1, %c0_2] : memref<1x256xf32, #tpu.memory_space<vmem>>, vector<1x256xf32>
    %2 = vector.shape_cast %1 : vector<1x256xf32> to vector<1x256xf32>
    %c0_3 = arith.constant 0 : index
    %c0_4 = arith.constant 0 : index
    %3 = vector.load %arg3[%c0_3, %c0_4] : memref<1x256xf32, #tpu.memory_space<vmem>>, vector<1x256xf32>
    %cst = arith.constant 1.000000e+00 : f32
    %4 = vector.broadcast %cst : f32 to vector<1x256xf32>
    %5 = arith.subf %4, %3 : vector<1x256xf32>
    %c0_5 = arith.constant 0 : index
    %c0_6 = arith.constant 0 : index
    %6 = vector.load %arg4[%c0_5, %c0_6] : memref<16x256xf32, #tpu.memory_space<vmem>>, vector<16x256xf32>
    %c0_7 = arith.constant 0 : index
    %c0_8 = arith.constant 0 : index
    %7 = vector.load %arg5[%c0_7, %c0_8] : memref<64x256xf32, #tpu.memory_space<vmem>>, vector<64x256xf32>
    %c0_9 = arith.constant 0 : index
    %c0_10 = arith.constant 0 : index
    %8 = vector.load %arg6[%c0_9, %c0_10] : memref<1x256xf32, #tpu.memory_space<vmem>>, vector<1x256xf32>
    %c0_11 = arith.constant 0 : index
    %c0_12 = arith.constant 0 : index
    %9 = vector.load %arg0[%c0_11, %c0_12] : memref<16x16xf32, #tpu.memory_space<vmem>>, vector<16x16xf32>
    %cst_13 = arith.constant dense<0.000000e+00> : vector<16x256xf32>
    %10 = tpu.matmul %9, %6, %cst_13 {dimension_numbers = #tpu.dot_dimension_numbers<[1], [0], [0], [1], [0, 0, 1, 1], [], []>} : vector<16x16xf32>, vector<16x256xf32>, vector<16x256xf32> -> vector<16x256xf32>
    %11 = vector.broadcast %8 : vector<1x256xf32> to vector<16x256xf32>
    %12 = arith.addf %10, %11 : vector<16x256xf32>
    %13 = vector.extract_strided_slice %12 {offsets = [14, 0], sizes = [2, 256], strides = [1, 1]} : vector<16x256xf32> to vector<2x256xf32>
    %14 = vector.extract_strided_slice %12 {offsets = [12, 0], sizes = [2, 256], strides = [1, 1]} : vector<16x256xf32> to vector<2x256xf32>
    %15 = vector.extract_strided_slice %12 {offsets = [10, 0], sizes = [2, 256], strides = [1, 1]} : vector<16x256xf32> to vector<2x256xf32>
    %16 = vector.extract_strided_slice %12 {offsets = [8, 0], sizes = [2, 256], strides = [1, 1]} : vector<16x256xf32> to vector<2x256xf32>
    %17 = vector.extract_strided_slice %12 {offsets = [6, 0], sizes = [2, 256], strides = [1, 1]} : vector<16x256xf32> to vector<2x256xf32>
    %18 = vector.extract_strided_slice %12 {offsets = [4, 0], sizes = [2, 256], strides = [1, 1]} : vector<16x256xf32> to vector<2x256xf32>
    %19 = vector.extract_strided_slice %12 {offsets = [2, 0], sizes = [2, 256], strides = [1, 1]} : vector<16x256xf32> to vector<2x256xf32>
    %20 = vector.extract_strided_slice %12 {offsets = [0, 0], sizes = [2, 256], strides = [1, 1]} : vector<16x256xf32> to vector<2x256xf32>
    %21 = tpu.concatenate %13, %14, %15, %16, %17, %18, %19, %20 in 0 : vector<2x256xf32>, vector<2x256xf32>, vector<2x256xf32>, vector<2x256xf32>, vector<2x256xf32>, vector<2x256xf32>, vector<2x256xf32>, vector<2x256xf32> -> vector<16x256xf32>
    %22 = vector.broadcast %3 : vector<1x256xf32> to vector<16x256xf32>
    %23 = arith.mulf %12, %22 : vector<16x256xf32>
    %24 = vector.broadcast %5 : vector<1x256xf32> to vector<16x256xf32>
    %25 = arith.mulf %21, %24 : vector<16x256xf32>
    %26 = arith.addf %23, %25 : vector<16x256xf32>
    %cst_14 = arith.constant 0.000000e+00 : f32
    %27 = vector.broadcast %cst_14 : f32 to vector<2x64xf32>
    %cst_15 = arith.constant 0.000000e+00 : f32
    %28 = vector.broadcast %cst_15 : f32 to vector<2x64xf32>
    %29 = vector.extract_strided_slice %26 {offsets = [0, 0], sizes = [2, 256], strides = [1, 1]} : vector<16x256xf32> to vector<2x256xf32>
    %cst_16 = arith.constant dense<0.000000e+00> : vector<2x256xf32>
    %30 = tpu.matmul %27, %7, %cst_16 {dimension_numbers = #tpu.dot_dimension_numbers<[1], [0], [0], [1], [0, 0, 1, 1], [], []>} : vector<2x64xf32>, vector<64x256xf32>, vector<2x256xf32> -> vector<2x256xf32>
    %31 = arith.addf %29, %30 : vector<2x256xf32>
    %32 = math.tanh %31 : vector<2x256xf32>
    %33 = vector.broadcast %0 : vector<1x256xf32> to vector<2x256xf32>
    %34 = arith.mulf %32, %33 : vector<2x256xf32>
    %35 = vector.broadcast %2 : vector<1x256xf32> to vector<2x256xf32>
    %36 = arith.addf %34, %35 : vector<2x256xf32>
    %37 = vector.extract_strided_slice %36 {offsets = [0, 0], sizes = [2, 64], strides = [1, 1]} : vector<2x256xf32> to vector<2x64xf32>
    %38 = vector.extract_strided_slice %36 {offsets = [0, 64], sizes = [2, 64], strides = [1, 1]} : vector<2x256xf32> to vector<2x64xf32>
    %39 = vector.extract_strided_slice %36 {offsets = [0, 128], sizes = [2, 64], strides = [1, 1]} : vector<2x256xf32> to vector<2x64xf32>
    %40 = vector.extract_strided_slice %36 {offsets = [0, 192], sizes = [2, 64], strides = [1, 1]} : vector<2x256xf32> to vector<2x64xf32>
    %41 = arith.mulf %38, %28 : vector<2x64xf32>
    %42 = arith.mulf %37, %39 : vector<2x64xf32>
    %43 = arith.addf %41, %42 : vector<2x64xf32>
    %44 = math.tanh %43 : vector<2x64xf32>
    %45 = arith.mulf %40, %44 : vector<2x64xf32>
    %c0_17 = arith.constant 0 : index
    %c0_18 = arith.constant 0 : index
    %46 = vector.load %arg15[%c0_17, %c0_18] : memref<16x64xf32, #tpu.memory_space<vmem>>, vector<2x64xf32>
    tpu.vector_store %arg15[%c0_17, %c0_18], %45 {strides = array<i32>} : memref<16x64xf32, #tpu.memory_space<vmem>>, vector<2x64xf32>,
    %c14 = arith.constant 14 : index
    %c0_19 = arith.constant 0 : index
    %47 = vector.load %arg16[%c14, %c0_19] : memref<16x64xf32, #tpu.memory_space<vmem>>, vector<2x64xf32>
    tpu.vector_store %arg16[%c14, %c0_19], %45 {strides = array<i32>} : memref<16x64xf32, #tpu.memory_space<vmem>>, vector<2x64xf32>,
    %48 = vector.extract_strided_slice %26 {offsets = [2, 0], sizes = [2, 256], strides = [1, 1]} : vector<16x256xf32> to vector<2x256xf32>
    %cst_20 = arith.constant dense<0.000000e+00> : vector<2x256xf32>
    %49 = tpu.matmul %45, %7, %cst_20 {dimension_numbers = #tpu.dot_dimension_numbers<[1], [0], [0], [1], [0, 0, 1, 1], [], []>} : vector<2x64xf32>, vector<64x256xf32>, vector<2x256xf32> -> vector<2x256xf32>
    %50 = arith.addf %48, %49 : vector<2x256xf32>
    %51 = math.tanh %50 : vector<2x256xf32>
    %52 = vector.broadcast %0 : vector<1x256xf32> to vector<2x256xf32>
    %53 = arith.mulf %51, %52 : vector<2x256xf32>
    %54 = vector.broadcast %2 : vector<1x256xf32> to vector<2x256xf32>
    %55 = arith.addf %53, %54 : vector<2x256xf32>
    %56 = vector.extract_strided_slice %55 {offsets = [0, 0], sizes = [2, 64], strides = [1, 1]} : vector<2x256xf32> to vector<2x64xf32>
    %57 = vector.extract_strided_slice %55 {offsets = [0, 64], sizes = [2, 64], strides = [1, 1]} : vector<2x256xf32> to vector<2x64xf32>
    %58 = vector.extract_strided_slice %55 {offsets = [0, 128], sizes = [2, 64], strides = [1, 1]} : vector<2x256xf32> to vector<2x64xf32>
    %59 = vector.extract_strided_slice %55 {offsets = [0, 192], sizes = [2, 64], strides = [1, 1]} : vector<2x256xf32> to vector<2x64xf32>
    %60 = arith.mulf %57, %43 : vector<2x64xf32>
    %61 = arith.mulf %56, %58 : vector<2x64xf32>
    %62 = arith.addf %60, %61 : vector<2x64xf32>
    %63 = math.tanh %62 : vector<2x64xf32>
    %64 = arith.mulf %59, %63 : vector<2x64xf32>
    %c2 = arith.constant 2 : index
    %c0_21 = arith.constant 0 : index
    %65 = vector.load %arg15[%c2, %c0_21] : memref<16x64xf32, #tpu.memory_space<vmem>>, vector<2x64xf32>
    tpu.vector_store %arg15[%c2, %c0_21], %64 {strides = array<i32>} : memref<16x64xf32, #tpu.memory_space<vmem>>, vector<2x64xf32>,
    %c12 = arith.constant 12 : index
    %c0_22 = arith.constant 0 : index
    %66 = vector.load %arg16[%c12, %c0_22] : memref<16x64xf32, #tpu.memory_space<vmem>>, vector<2x64xf32>
    tpu.vector_store %arg16[%c12, %c0_22], %64 {strides = array<i32>} : memref<16x64xf32, #tpu.memory_space<vmem>>, vector<2x64xf32>,
    %67 = vector.extract_strided_slice %26 {offsets = [4, 0], sizes = [2, 256], strides = [1, 1]} : vector<16x256xf32> to vector<2x256xf32>
    %cst_23 = arith.constant dense<0.000000e+00> : vector<2x256xf32>
    %68 = tpu.matmul %64, %7, %cst_23 {dimension_numbers = #tpu.dot_dimension_numbers<[1], [0], [0], [1], [0, 0, 1, 1], [], []>} : vector<2x64xf32>, vector<64x256xf32>, vector<2x256xf32> -> vector<2x256xf32>
    %69 = arith.addf %67, %68 : vector<2x256xf32>
    %70 = math.tanh %69 : vector<2x256xf32>
    %71 = vector.broadcast %0 : vector<1x256xf32> to vector<2x256xf32>
    %72 = arith.mulf %70, %71 : vector<2x256xf32>
    %73 = vector.broadcast %2 : vector<1x256xf32> to vector<2x256xf32>
    %74 = arith.addf %72, %73 : vector<2x256xf32>
    %75 = vector.extract_strided_slice %74 {offsets = [0, 0], sizes = [2, 64], strides = [1, 1]} : vector<2x256xf32> to vector<2x64xf32>
    %76 = vector.extract_strided_slice %74 {offsets = [0, 64], sizes = [2, 64], strides = [1, 1]} : vector<2x256xf32> to vector<2x64xf32>
    %77 = vector.extract_strided_slice %74 {offsets = [0, 128], sizes = [2, 64], strides = [1, 1]} : vector<2x256xf32> to vector<2x64xf32>
    %78 = vector.extract_strided_slice %74 {offsets = [0, 192], sizes = [2, 64], strides = [1, 1]} : vector<2x256xf32> to vector<2x64xf32>
    %79 = arith.mulf %76, %62 : vector<2x64xf32>
    %80 = arith.mulf %75, %77 : vector<2x64xf32>
    %81 = arith.addf %79, %80 : vector<2x64xf32>
    %82 = math.tanh %81 : vector<2x64xf32>
    %83 = arith.mulf %78, %82 : vector<2x64xf32>
    %c4 = arith.constant 4 : index
    %c0_24 = arith.constant 0 : index
    %84 = vector.load %arg15[%c4, %c0_24] : memref<16x64xf32, #tpu.memory_space<vmem>>, vector<2x64xf32>
    tpu.vector_store %arg15[%c4, %c0_24], %83 {strides = array<i32>} : memref<16x64xf32, #tpu.memory_space<vmem>>, vector<2x64xf32>,
    %c10 = arith.constant 10 : index
    %c0_25 = arith.constant 0 : index
    %85 = vector.load %arg16[%c10, %c0_25] : memref<16x64xf32, #tpu.memory_space<vmem>>, vector<2x64xf32>
    tpu.vector_store %arg16[%c10, %c0_25], %83 {strides = array<i32>} : memref<16x64xf32, #tpu.memory_space<vmem>>, vector<2x64xf32>,
    %86 = vector.extract_strided_slice %26 {offsets = [6, 0], sizes = [2, 256], strides = [1, 1]} : vector<16x256xf32> to vector<2x256xf32>
    %cst_26 = arith.constant dense<0.000000e+00> : vector<2x256xf32>
    %87 = tpu.matmul %83, %7, %cst_26 {dimension_numbers = #tpu.dot_dimension_numbers<[1], [0], [0], [1], [0, 0, 1, 1], [], []>} : vector<2x64xf32>, vector<64x256xf32>, vector<2x256xf32> -> vector<2x256xf32>
    %88 = arith.addf %86, %87 : vector<2x256xf32>
    %89 = math.tanh %88 : vector<2x256xf32>
    %90 = vector.broadcast %0 : vector<1x256xf32> to vector<2x256xf32>
    %91 = arith.mulf %89, %90 : vector<2x256xf32>
    %92 = vector.broadcast %2 : vector<1x256xf32> to vector<2x256xf32>
    %93 = arith.addf %91, %92 : vector<2x256xf32>
    %94 = vector.extract_strided_slice %93 {offsets = [0, 0], sizes = [2, 64], strides = [1, 1]} : vector<2x256xf32> to vector<2x64xf32>
    %95 = vector.extract_strided_slice %93 {offsets = [0, 64], sizes = [2, 64], strides = [1, 1]} : vector<2x256xf32> to vector<2x64xf32>
    %96 = vector.extract_strided_slice %93 {offsets = [0, 128], sizes = [2, 64], strides = [1, 1]} : vector<2x256xf32> to vector<2x64xf32>
    %97 = vector.extract_strided_slice %93 {offsets = [0, 192], sizes = [2, 64], strides = [1, 1]} : vector<2x256xf32> to vector<2x64xf32>
    %98 = arith.mulf %95, %81 : vector<2x64xf32>
    %99 = arith.mulf %94, %96 : vector<2x64xf32>
    %100 = arith.addf %98, %99 : vector<2x64xf32>
    %101 = math.tanh %100 : vector<2x64xf32>
    %102 = arith.mulf %97, %101 : vector<2x64xf32>
    %c6 = arith.constant 6 : index
    %c0_27 = arith.constant 0 : index
    %103 = vector.load %arg15[%c6, %c0_27] : memref<16x64xf32, #tpu.memory_space<vmem>>, vector<2x64xf32>
    tpu.vector_store %arg15[%c6, %c0_27], %102 {strides = array<i32>} : memref<16x64xf32, #tpu.memory_space<vmem>>, vector<2x64xf32>,
    %c8 = arith.constant 8 : index
    %c0_28 = arith.constant 0 : index
    %104 = vector.load %arg16[%c8, %c0_28] : memref<16x64xf32, #tpu.memory_space<vmem>>, vector<2x64xf32>
    tpu.vector_store %arg16[%c8, %c0_28], %102 {strides = array<i32>} : memref<16x64xf32, #tpu.memory_space<vmem>>, vector<2x64xf32>,
    %105 = vector.extract_strided_slice %26 {offsets = [8, 0], sizes = [2, 256], strides = [1, 1]} : vector<16x256xf32> to vector<2x256xf32>
    %cst_29 = arith.constant dense<0.000000e+00> : vector<2x256xf32>
    %106 = tpu.matmul %102, %7, %cst_29 {dimension_numbers = #tpu.dot_dimension_numbers<[1], [0], [0], [1], [0, 0, 1, 1], [], []>} : vector<2x64xf32>, vector<64x256xf32>, vector<2x256xf32> -> vector<2x256xf32>
    %107 = arith.addf %105, %106 : vector<2x256xf32>
    %108 = math.tanh %107 : vector<2x256xf32>
    %109 = vector.broadcast %0 : vector<1x256xf32> to vector<2x256xf32>
    %110 = arith.mulf %108, %109 : vector<2x256xf32>
    %111 = vector.broadcast %2 : vector<1x256xf32> to vector<2x256xf32>
    %112 = arith.addf %110, %111 : vector<2x256xf32>
    %113 = vector.extract_strided_slice %112 {offsets = [0, 0], sizes = [2, 64], strides = [1, 1]} : vector<2x256xf32> to vector<2x64xf32>
    %114 = vector.extract_strided_slice %112 {offsets = [0, 64], sizes = [2, 64], strides = [1, 1]} : vector<2x256xf32> to vector<2x64xf32>
    %115 = vector.extract_strided_slice %112 {offsets = [0, 128], sizes = [2, 64], strides = [1, 1]} : vector<2x256xf32> to vector<2x64xf32>
    %116 = vector.extract_strided_slice %112 {offsets = [0, 192], sizes = [2, 64], strides = [1, 1]} : vector<2x256xf32> to vector<2x64xf32>
    %117 = arith.mulf %114, %100 : vector<2x64xf32>
    %118 = arith.mulf %113, %115 : vector<2x64xf32>
    %119 = arith.addf %117, %118 : vector<2x64xf32>
    %120 = math.tanh %119 : vector<2x64xf32>
    %121 = arith.mulf %116, %120 : vector<2x64xf32>
    %c8_30 = arith.constant 8 : index
    %c0_31 = arith.constant 0 : index
    %122 = vector.load %arg15[%c8_30, %c0_31] : memref<16x64xf32, #tpu.memory_space<vmem>>, vector<2x64xf32>
    tpu.vector_store %arg15[%c8_30, %c0_31], %121 {strides = array<i32>} : memref<16x64xf32, #tpu.memory_space<vmem>>, vector<2x64xf32>,
    %c6_32 = arith.constant 6 : index
    %c0_33 = arith.constant 0 : index
    %123 = vector.load %arg16[%c6_32, %c0_33] : memref<16x64xf32, #tpu.memory_space<vmem>>, vector<2x64xf32>
    tpu.vector_store %arg16[%c6_32, %c0_33], %121 {strides = array<i32>} : memref<16x64xf32, #tpu.memory_space<vmem>>, vector<2x64xf32>,
    %124 = vector.extract_strided_slice %26 {offsets = [10, 0], sizes = [2, 256], strides = [1, 1]} : vector<16x256xf32> to vector<2x256xf32>
    %cst_34 = arith.constant dense<0.000000e+00> : vector<2x256xf32>
    %125 = tpu.matmul %121, %7, %cst_34 {dimension_numbers = #tpu.dot_dimension_numbers<[1], [0], [0], [1], [0, 0, 1, 1], [], []>} : vector<2x64xf32>, vector<64x256xf32>, vector<2x256xf32> -> vector<2x256xf32>
    %126 = arith.addf %124, %125 : vector<2x256xf32>
    %127 = math.tanh %126 : vector<2x256xf32>
    %128 = vector.broadcast %0 : vector<1x256xf32> to vector<2x256xf32>
    %129 = arith.mulf %127, %128 : vector<2x256xf32>
    %130 = vector.broadcast %2 : vector<1x256xf32> to vector<2x256xf32>
    %131 = arith.addf %129, %130 : vector<2x256xf32>
    %132 = vector.extract_strided_slice %131 {offsets = [0, 0], sizes = [2, 64], strides = [1, 1]} : vector<2x256xf32> to vector<2x64xf32>
    %133 = vector.extract_strided_slice %131 {offsets = [0, 64], sizes = [2, 64], strides = [1, 1]} : vector<2x256xf32> to vector<2x64xf32>
    %134 = vector.extract_strided_slice %131 {offsets = [0, 128], sizes = [2, 64], strides = [1, 1]} : vector<2x256xf32> to vector<2x64xf32>
    %135 = vector.extract_strided_slice %131 {offsets = [0, 192], sizes = [2, 64], strides = [1, 1]} : vector<2x256xf32> to vector<2x64xf32>
    %136 = arith.mulf %133, %119 : vector<2x64xf32>
    %137 = arith.mulf %132, %134 : vector<2x64xf32>
    %138 = arith.addf %136, %137 : vector<2x64xf32>
    %139 = math.tanh %138 : vector<2x64xf32>
    %140 = arith.mulf %135, %139 : vector<2x64xf32>
    %c10_35 = arith.constant 10 : index
    %c0_36 = arith.constant 0 : index
    %141 = vector.load %arg15[%c10_35, %c0_36] : memref<16x64xf32, #tpu.memory_space<vmem>>, vector<2x64xf32>
    tpu.vector_store %arg15[%c10_35, %c0_36], %140 {strides = array<i32>} : memref<16x64xf32, #tpu.memory_space<vmem>>, vector<2x64xf32>,
    %c4_37 = arith.constant 4 : index
    %c0_38 = arith.constant 0 : index
    %142 = vector.load %arg16[%c4_37, %c0_38] : memref<16x64xf32, #tpu.memory_space<vmem>>, vector<2x64xf32>
    tpu.vector_store %arg16[%c4_37, %c0_38], %140 {strides = array<i32>} : memref<16x64xf32, #tpu.memory_space<vmem>>, vector<2x64xf32>,
    %143 = vector.extract_strided_slice %26 {offsets = [12, 0], sizes = [2, 256], strides = [1, 1]} : vector<16x256xf32> to vector<2x256xf32>
    %cst_39 = arith.constant dense<0.000000e+00> : vector<2x256xf32>
    %144 = tpu.matmul %140, %7, %cst_39 {dimension_numbers = #tpu.dot_dimension_numbers<[1], [0], [0], [1], [0, 0, 1, 1], [], []>} : vector<2x64xf32>, vector<64x256xf32>, vector<2x256xf32> -> vector<2x256xf32>
    %145 = arith.addf %143, %144 : vector<2x256xf32>
    %146 = math.tanh %145 : vector<2x256xf32>
    %147 = vector.broadcast %0 : vector<1x256xf32> to vector<2x256xf32>
    %148 = arith.mulf %146, %147 : vector<2x256xf32>
    %149 = vector.broadcast %2 : vector<1x256xf32> to vector<2x256xf32>
    %150 = arith.addf %148, %149 : vector<2x256xf32>
    %151 = vector.extract_strided_slice %150 {offsets = [0, 0], sizes = [2, 64], strides = [1, 1]} : vector<2x256xf32> to vector<2x64xf32>
    %152 = vector.extract_strided_slice %150 {offsets = [0, 64], sizes = [2, 64], strides = [1, 1]} : vector<2x256xf32> to vector<2x64xf32>
    %153 = vector.extract_strided_slice %150 {offsets = [0, 128], sizes = [2, 64], strides = [1, 1]} : vector<2x256xf32> to vector<2x64xf32>
    %154 = vector.extract_strided_slice %150 {offsets = [0, 192], sizes = [2, 64], strides = [1, 1]} : vector<2x256xf32> to vector<2x64xf32>
    %155 = arith.mulf %152, %138 : vector<2x64xf32>
    %156 = arith.mulf %151, %153 : vector<2x64xf32>
    %157 = arith.addf %155, %156 : vector<2x64xf32>
    %158 = math.tanh %157 : vector<2x64xf32>
    %159 = arith.mulf %154, %158 : vector<2x64xf32>
    %c12_40 = arith.constant 12 : index
    %c0_41 = arith.constant 0 : index
    %160 = vector.load %arg15[%c12_40, %c0_41] : memref<16x64xf32, #tpu.memory_space<vmem>>, vector<2x64xf32>
    tpu.vector_store %arg15[%c12_40, %c0_41], %159 {strides = array<i32>} : memref<16x64xf32, #tpu.memory_space<vmem>>, vector<2x64xf32>,
    %c2_42 = arith.constant 2 : index
    %c0_43 = arith.constant 0 : index
    %161 = vector.load %arg16[%c2_42, %c0_43] : memref<16x64xf32, #tpu.memory_space<vmem>>, vector<2x64xf32>
    tpu.vector_store %arg16[%c2_42, %c0_43], %159 {strides = array<i32>} : memref<16x64xf32, #tpu.memory_space<vmem>>, vector<2x64xf32>,
    %162 = vector.extract_strided_slice %26 {offsets = [14, 0], sizes = [2, 256], strides = [1, 1]} : vector<16x256xf32> to vector<2x256xf32>
    %cst_44 = arith.constant dense<0.000000e+00> : vector<2x256xf32>
    %163 = tpu.matmul %159, %7, %cst_44 {dimension_numbers = #tpu.dot_dimension_numbers<[1], [0], [0], [1], [0, 0, 1, 1], [], []>} : vector<2x64xf32>, vector<64x256xf32>, vector<2x256xf32> -> vector<2x256xf32>
    %164 = arith.addf %162, %163 : vector<2x256xf32>
    %165 = math.tanh %164 : vector<2x256xf32>
    %166 = vector.broadcast %0 : vector<1x256xf32> to vector<2x256xf32>
    %167 = arith.mulf %165, %166 : vector<2x256xf32>
    %168 = vector.broadcast %2 : vector<1x256xf32> to vector<2x256xf32>
    %169 = arith.addf %167, %168 : vector<2x256xf32>
    %170 = vector.extract_strided_slice %169 {offsets = [0, 0], sizes = [2, 64], strides = [1, 1]} : vector<2x256xf32> to vector<2x64xf32>
    %171 = vector.extract_strided_slice %169 {offsets = [0, 64], sizes = [2, 64], strides = [1, 1]} : vector<2x256xf32> to vector<2x64xf32>
    %172 = vector.extract_strided_slice %169 {offsets = [0, 128], sizes = [2, 64], strides = [1, 1]} : vector<2x256xf32> to vector<2x64xf32>
    %173 = vector.extract_strided_slice %169 {offsets = [0, 192], sizes = [2, 64], strides = [1, 1]} : vector<2x256xf32> to vector<2x64xf32>
    %174 = arith.mulf %171, %157 : vector<2x64xf32>
    %175 = arith.mulf %170, %172 : vector<2x64xf32>
    %176 = arith.addf %174, %175 : vector<2x64xf32>
    %177 = math.tanh %176 : vector<2x64xf32>
    %178 = arith.mulf %173, %177 : vector<2x64xf32>
    %c14_45 = arith.constant 14 : index
    %c0_46 = arith.constant 0 : index
    %179 = vector.load %arg15[%c14_45, %c0_46] : memref<16x64xf32, #tpu.memory_space<vmem>>, vector<2x64xf32>
    tpu.vector_store %arg15[%c14_45, %c0_46], %178 {strides = array<i32>} : memref<16x64xf32, #tpu.memory_space<vmem>>, vector<2x64xf32>,
    %c0_47 = arith.constant 0 : index
    %c0_48 = arith.constant 0 : index
    %180 = vector.load %arg16[%c0_47, %c0_48] : memref<16x64xf32, #tpu.memory_space<vmem>>, vector<2x64xf32>
    tpu.vector_store %arg16[%c0_47, %c0_48], %178 {strides = array<i32>} : memref<16x64xf32, #tpu.memory_space<vmem>>, vector<2x64xf32>,
    %c0_49 = arith.constant 0 : index
    %c0_50 = arith.constant 0 : index
    %181 = vector.load %arg7[%c0_49, %c0_50] : memref<64x256xf32, #tpu.memory_space<vmem>>, vector<64x256xf32>
    %c0_51 = arith.constant 0 : index
    %c0_52 = arith.constant 0 : index
    %182 = vector.load %arg8[%c0_51, %c0_52] : memref<64x256xf32, #tpu.memory_space<vmem>>, vector<64x256xf32>
    %c0_53 = arith.constant 0 : index
    %c0_54 = arith.constant 0 : index
    %183 = vector.load %arg9[%c0_53, %c0_54] : memref<64x256xf32, #tpu.memory_space<vmem>>, vector<64x256xf32>
    %c0_55 = arith.constant 0 : index
    %c0_56 = arith.constant 0 : index
    %184 = vector.load %arg10[%c0_55, %c0_56] : memref<1x256xf32, #tpu.memory_space<vmem>>, vector<1x256xf32>
    %c0_57 = arith.constant 0 : index
    %c0_58 = arith.constant 0 : index
    %185 = vector.load %arg15[%c0_57, %c0_58] : memref<16x64xf32, #tpu.memory_space<vmem>>, vector<16x64xf32>
    %cst_59 = arith.constant dense<0.000000e+00> : vector<16x256xf32>
    %186 = tpu.matmul %185, %181, %cst_59 {dimension_numbers = #tpu.dot_dimension_numbers<[1], [0], [0], [1], [0, 0, 1, 1], [], []>} : vector<16x64xf32>, vector<64x256xf32>, vector<16x256xf32> -> vector<16x256xf32>
    %c0_60 = arith.constant 0 : index
    %c0_61 = arith.constant 0 : index
    %187 = vector.load %arg16[%c0_60, %c0_61] : memref<16x64xf32, #tpu.memory_space<vmem>>, vector<16x64xf32>
    %cst_62 = arith.constant dense<0.000000e+00> : vector<16x256xf32>
    %188 = tpu.matmul %187, %182, %cst_62 {dimension_numbers = #tpu.dot_dimension_numbers<[1], [0], [0], [1], [0, 0, 1, 1], [], []>} : vector<16x64xf32>, vector<64x256xf32>, vector<16x256xf32> -> vector<16x256xf32>
    %189 = arith.addf %186, %188 : vector<16x256xf32>
    %190 = vector.broadcast %184 : vector<1x256xf32> to vector<16x256xf32>
    %191 = arith.addf %189, %190 : vector<16x256xf32>
    %192 = vector.extract_strided_slice %191 {offsets = [14, 0], sizes = [2, 256], strides = [1, 1]} : vector<16x256xf32> to vector<2x256xf32>
    %193 = vector.extract_strided_slice %191 {offsets = [12, 0], sizes = [2, 256], strides = [1, 1]} : vector<16x256xf32> to vector<2x256xf32>
    %194 = vector.extract_strided_slice %191 {offsets = [10, 0], sizes = [2, 256], strides = [1, 1]} : vector<16x256xf32> to vector<2x256xf32>
    %195 = vector.extract_strided_slice %191 {offsets = [8, 0], sizes = [2, 256], strides = [1, 1]} : vector<16x256xf32> to vector<2x256xf32>
    %196 = vector.extract_strided_slice %191 {offsets = [6, 0], sizes = [2, 256], strides = [1, 1]} : vector<16x256xf32> to vector<2x256xf32>
    %197 = vector.extract_strided_slice %191 {offsets = [4, 0], sizes = [2, 256], strides = [1, 1]} : vector<16x256xf32> to vector<2x256xf32>
    %198 = vector.extract_strided_slice %191 {offsets = [2, 0], sizes = [2, 256], strides = [1, 1]} : vector<16x256xf32> to vector<2x256xf32>
    %199 = vector.extract_strided_slice %191 {offsets = [0, 0], sizes = [2, 256], strides = [1, 1]} : vector<16x256xf32> to vector<2x256xf32>
    %200 = tpu.concatenate %192, %193, %194, %195, %196, %197, %198, %199 in 0 : vector<2x256xf32>, vector<2x256xf32>, vector<2x256xf32>, vector<2x256xf32>, vector<2x256xf32>, vector<2x256xf32>, vector<2x256xf32>, vector<2x256xf32> -> vector<16x256xf32>
    %201 = vector.broadcast %3 : vector<1x256xf32> to vector<16x256xf32>
    %202 = arith.mulf %191, %201 : vector<16x256xf32>
    %203 = vector.broadcast %5 : vector<1x256xf32> to vector<16x256xf32>
    %204 = arith.mulf %200, %203 : vector<16x256xf32>
    %205 = arith.addf %202, %204 : vector<16x256xf32>
    %cst_63 = arith.constant 0.000000e+00 : f32
    %206 = vector.broadcast %cst_63 : f32 to vector<2x64xf32>
    %cst_64 = arith.constant 0.000000e+00 : f32
    %207 = vector.broadcast %cst_64 : f32 to vector<2x64xf32>
    %208 = vector.extract_strided_slice %205 {offsets = [0, 0], sizes = [2, 256], strides = [1, 1]} : vector<16x256xf32> to vector<2x256xf32>
    %cst_65 = arith.constant dense<0.000000e+00> : vector<2x256xf32>
    %209 = tpu.matmul %206, %183, %cst_65 {dimension_numbers = #tpu.dot_dimension_numbers<[1], [0], [0], [1], [0, 0, 1, 1], [], []>} : vector<2x64xf32>, vector<64x256xf32>, vector<2x256xf32> -> vector<2x256xf32>
    %210 = arith.addf %208, %209 : vector<2x256xf32>
    %211 = math.tanh %210 : vector<2x256xf32>
    %212 = vector.broadcast %0 : vector<1x256xf32> to vector<2x256xf32>
    %213 = arith.mulf %211, %212 : vector<2x256xf32>
    %214 = vector.broadcast %2 : vector<1x256xf32> to vector<2x256xf32>
    %215 = arith.addf %213, %214 : vector<2x256xf32>
    %216 = vector.extract_strided_slice %215 {offsets = [0, 0], sizes = [2, 64], strides = [1, 1]} : vector<2x256xf32> to vector<2x64xf32>
    %217 = vector.extract_strided_slice %215 {offsets = [0, 64], sizes = [2, 64], strides = [1, 1]} : vector<2x256xf32> to vector<2x64xf32>
    %218 = vector.extract_strided_slice %215 {offsets = [0, 128], sizes = [2, 64], strides = [1, 1]} : vector<2x256xf32> to vector<2x64xf32>
    %219 = vector.extract_strided_slice %215 {offsets = [0, 192], sizes = [2, 64], strides = [1, 1]} : vector<2x256xf32> to vector<2x64xf32>
    %220 = arith.mulf %217, %207 : vector<2x64xf32>
    %221 = arith.mulf %216, %218 : vector<2x64xf32>
    %222 = arith.addf %220, %221 : vector<2x64xf32>
    %223 = math.tanh %222 : vector<2x64xf32>
    %224 = arith.mulf %219, %223 : vector<2x64xf32>
    %225 = vector.extract_strided_slice %205 {offsets = [2, 0], sizes = [2, 256], strides = [1, 1]} : vector<16x256xf32> to vector<2x256xf32>
    %cst_66 = arith.constant dense<0.000000e+00> : vector<2x256xf32>
    %226 = tpu.matmul %224, %183, %cst_66 {dimension_numbers = #tpu.dot_dimension_numbers<[1], [0], [0], [1], [0, 0, 1, 1], [], []>} : vector<2x64xf32>, vector<64x256xf32>, vector<2x256xf32> -> vector<2x256xf32>
    %227 = arith.addf %225, %226 : vector<2x256xf32>
    %228 = math.tanh %227 : vector<2x256xf32>
    %229 = vector.broadcast %0 : vector<1x256xf32> to vector<2x256xf32>
    %230 = arith.mulf %228, %229 : vector<2x256xf32>
    %231 = vector.broadcast %2 : vector<1x256xf32> to vector<2x256xf32>
    %232 = arith.addf %230, %231 : vector<2x256xf32>
    %233 = vector.extract_strided_slice %232 {offsets = [0, 0], sizes = [2, 64], strides = [1, 1]} : vector<2x256xf32> to vector<2x64xf32>
    %234 = vector.extract_strided_slice %232 {offsets = [0, 64], sizes = [2, 64], strides = [1, 1]} : vector<2x256xf32> to vector<2x64xf32>
    %235 = vector.extract_strided_slice %232 {offsets = [0, 128], sizes = [2, 64], strides = [1, 1]} : vector<2x256xf32> to vector<2x64xf32>
    %236 = vector.extract_strided_slice %232 {offsets = [0, 192], sizes = [2, 64], strides = [1, 1]} : vector<2x256xf32> to vector<2x64xf32>
    %237 = arith.mulf %234, %222 : vector<2x64xf32>
    %238 = arith.mulf %233, %235 : vector<2x64xf32>
    %239 = arith.addf %237, %238 : vector<2x64xf32>
    %240 = math.tanh %239 : vector<2x64xf32>
    %241 = arith.mulf %236, %240 : vector<2x64xf32>
    %242 = vector.extract_strided_slice %205 {offsets = [4, 0], sizes = [2, 256], strides = [1, 1]} : vector<16x256xf32> to vector<2x256xf32>
    %cst_67 = arith.constant dense<0.000000e+00> : vector<2x256xf32>
    %243 = tpu.matmul %241, %183, %cst_67 {dimension_numbers = #tpu.dot_dimension_numbers<[1], [0], [0], [1], [0, 0, 1, 1], [], []>} : vector<2x64xf32>, vector<64x256xf32>, vector<2x256xf32> -> vector<2x256xf32>
    %244 = arith.addf %242, %243 : vector<2x256xf32>
    %245 = math.tanh %244 : vector<2x256xf32>
    %246 = vector.broadcast %0 : vector<1x256xf32> to vector<2x256xf32>
    %247 = arith.mulf %245, %246 : vector<2x256xf32>
    %248 = vector.broadcast %2 : vector<1x256xf32> to vector<2x256xf32>
    %249 = arith.addf %247, %248 : vector<2x256xf32>
    %250 = vector.extract_strided_slice %249 {offsets = [0, 0], sizes = [2, 64], strides = [1, 1]} : vector<2x256xf32> to vector<2x64xf32>
    %251 = vector.extract_strided_slice %249 {offsets = [0, 64], sizes = [2, 64], strides = [1, 1]} : vector<2x256xf32> to vector<2x64xf32>
    %252 = vector.extract_strided_slice %249 {offsets = [0, 128], sizes = [2, 64], strides = [1, 1]} : vector<2x256xf32> to vector<2x64xf32>
    %253 = vector.extract_strided_slice %249 {offsets = [0, 192], sizes = [2, 64], strides = [1, 1]} : vector<2x256xf32> to vector<2x64xf32>
    %254 = arith.mulf %251, %239 : vector<2x64xf32>
    %255 = arith.mulf %250, %252 : vector<2x64xf32>
    %256 = arith.addf %254, %255 : vector<2x64xf32>
    %257 = math.tanh %256 : vector<2x64xf32>
    %258 = arith.mulf %253, %257 : vector<2x64xf32>
    %259 = vector.extract_strided_slice %205 {offsets = [6, 0], sizes = [2, 256], strides = [1, 1]} : vector<16x256xf32> to vector<2x256xf32>
    %cst_68 = arith.constant dense<0.000000e+00> : vector<2x256xf32>
    %260 = tpu.matmul %258, %183, %cst_68 {dimension_numbers = #tpu.dot_dimension_numbers<[1], [0], [0], [1], [0, 0, 1, 1], [], []>} : vector<2x64xf32>, vector<64x256xf32>, vector<2x256xf32> -> vector<2x256xf32>
    %261 = arith.addf %259, %260 : vector<2x256xf32>
    %262 = math.tanh %261 : vector<2x256xf32>
    %263 = vector.broadcast %0 : vector<1x256xf32> to vector<2x256xf32>
    %264 = arith.mulf %262, %263 : vector<2x256xf32>
    %265 = vector.broadcast %2 : vector<1x256xf32> to vector<2x256xf32>
    %266 = arith.addf %264, %265 : vector<2x256xf32>
    %267 = vector.extract_strided_slice %266 {offsets = [0, 0], sizes = [2, 64], strides = [1, 1]} : vector<2x256xf32> to vector<2x64xf32>
    %268 = vector.extract_strided_slice %266 {offsets = [0, 64], sizes = [2, 64], strides = [1, 1]} : vector<2x256xf32> to vector<2x64xf32>
    %269 = vector.extract_strided_slice %266 {offsets = [0, 128], sizes = [2, 64], strides = [1, 1]} : vector<2x256xf32> to vector<2x64xf32>
    %270 = vector.extract_strided_slice %266 {offsets = [0, 192], sizes = [2, 64], strides = [1, 1]} : vector<2x256xf32> to vector<2x64xf32>
    %271 = arith.mulf %268, %256 : vector<2x64xf32>
    %272 = arith.mulf %267, %269 : vector<2x64xf32>
    %273 = arith.addf %271, %272 : vector<2x64xf32>
    %274 = math.tanh %273 : vector<2x64xf32>
    %275 = arith.mulf %270, %274 : vector<2x64xf32>
    %276 = vector.extract_strided_slice %205 {offsets = [8, 0], sizes = [2, 256], strides = [1, 1]} : vector<16x256xf32> to vector<2x256xf32>
    %cst_69 = arith.constant dense<0.000000e+00> : vector<2x256xf32>
    %277 = tpu.matmul %275, %183, %cst_69 {dimension_numbers = #tpu.dot_dimension_numbers<[1], [0], [0], [1], [0, 0, 1, 1], [], []>} : vector<2x64xf32>, vector<64x256xf32>, vector<2x256xf32> -> vector<2x256xf32>
    %278 = arith.addf %276, %277 : vector<2x256xf32>
    %279 = math.tanh %278 : vector<2x256xf32>
    %280 = vector.broadcast %0 : vector<1x256xf32> to vector<2x256xf32>
    %281 = arith.mulf %279, %280 : vector<2x256xf32>
    %282 = vector.broadcast %2 : vector<1x256xf32> to vector<2x256xf32>
    %283 = arith.addf %281, %282 : vector<2x256xf32>
    %284 = vector.extract_strided_slice %283 {offsets = [0, 0], sizes = [2, 64], strides = [1, 1]} : vector<2x256xf32> to vector<2x64xf32>
    %285 = vector.extract_strided_slice %283 {offsets = [0, 64], sizes = [2, 64], strides = [1, 1]} : vector<2x256xf32> to vector<2x64xf32>
    %286 = vector.extract_strided_slice %283 {offsets = [0, 128], sizes = [2, 64], strides = [1, 1]} : vector<2x256xf32> to vector<2x64xf32>
    %287 = vector.extract_strided_slice %283 {offsets = [0, 192], sizes = [2, 64], strides = [1, 1]} : vector<2x256xf32> to vector<2x64xf32>
    %288 = arith.mulf %285, %273 : vector<2x64xf32>
    %289 = arith.mulf %284, %286 : vector<2x64xf32>
    %290 = arith.addf %288, %289 : vector<2x64xf32>
    %291 = math.tanh %290 : vector<2x64xf32>
    %292 = arith.mulf %287, %291 : vector<2x64xf32>
    %293 = vector.extract_strided_slice %205 {offsets = [10, 0], sizes = [2, 256], strides = [1, 1]} : vector<16x256xf32> to vector<2x256xf32>
    %cst_70 = arith.constant dense<0.000000e+00> : vector<2x256xf32>
    %294 = tpu.matmul %292, %183, %cst_70 {dimension_numbers = #tpu.dot_dimension_numbers<[1], [0], [0], [1], [0, 0, 1, 1], [], []>} : vector<2x64xf32>, vector<64x256xf32>, vector<2x256xf32> -> vector<2x256xf32>
    %295 = arith.addf %293, %294 : vector<2x256xf32>
    %296 = math.tanh %295 : vector<2x256xf32>
    %297 = vector.broadcast %0 : vector<1x256xf32> to vector<2x256xf32>
    %298 = arith.mulf %296, %297 : vector<2x256xf32>
    %299 = vector.broadcast %2 : vector<1x256xf32> to vector<2x256xf32>
    %300 = arith.addf %298, %299 : vector<2x256xf32>
    %301 = vector.extract_strided_slice %300 {offsets = [0, 0], sizes = [2, 64], strides = [1, 1]} : vector<2x256xf32> to vector<2x64xf32>
    %302 = vector.extract_strided_slice %300 {offsets = [0, 64], sizes = [2, 64], strides = [1, 1]} : vector<2x256xf32> to vector<2x64xf32>
    %303 = vector.extract_strided_slice %300 {offsets = [0, 128], sizes = [2, 64], strides = [1, 1]} : vector<2x256xf32> to vector<2x64xf32>
    %304 = vector.extract_strided_slice %300 {offsets = [0, 192], sizes = [2, 64], strides = [1, 1]} : vector<2x256xf32> to vector<2x64xf32>
    %305 = arith.mulf %302, %290 : vector<2x64xf32>
    %306 = arith.mulf %301, %303 : vector<2x64xf32>
    %307 = arith.addf %305, %306 : vector<2x64xf32>
    %308 = math.tanh %307 : vector<2x64xf32>
    %309 = arith.mulf %304, %308 : vector<2x64xf32>
    %310 = vector.extract_strided_slice %205 {offsets = [12, 0], sizes = [2, 256], strides = [1, 1]} : vector<16x256xf32> to vector<2x256xf32>
    %cst_71 = arith.constant dense<0.000000e+00> : vector<2x256xf32>
    %311 = tpu.matmul %309, %183, %cst_71 {dimension_numbers = #tpu.dot_dimension_numbers<[1], [0], [0], [1], [0, 0, 1, 1], [], []>} : vector<2x64xf32>, vector<64x256xf32>, vector<2x256xf32> -> vector<2x256xf32>
    %312 = arith.addf %310, %311 : vector<2x256xf32>
    %313 = math.tanh %312 : vector<2x256xf32>
    %314 = vector.broadcast %0 : vector<1x256xf32> to vector<2x256xf32>
    %315 = arith.mulf %313, %314 : vector<2x256xf32>
    %316 = vector.broadcast %2 : vector<1x256xf32> to vector<2x256xf32>
    %317 = arith.addf %315, %316 : vector<2x256xf32>
    %318 = vector.extract_strided_slice %317 {offsets = [0, 0], sizes = [2, 64], strides = [1, 1]} : vector<2x256xf32> to vector<2x64xf32>
    %319 = vector.extract_strided_slice %317 {offsets = [0, 64], sizes = [2, 64], strides = [1, 1]} : vector<2x256xf32> to vector<2x64xf32>
    %320 = vector.extract_strided_slice %317 {offsets = [0, 128], sizes = [2, 64], strides = [1, 1]} : vector<2x256xf32> to vector<2x64xf32>
    %321 = vector.extract_strided_slice %317 {offsets = [0, 192], sizes = [2, 64], strides = [1, 1]} : vector<2x256xf32> to vector<2x64xf32>
    %322 = arith.mulf %319, %307 : vector<2x64xf32>
    %323 = arith.mulf %318, %320 : vector<2x64xf32>
    %324 = arith.addf %322, %323 : vector<2x64xf32>
    %325 = math.tanh %324 : vector<2x64xf32>
    %326 = arith.mulf %321, %325 : vector<2x64xf32>
    %327 = vector.extract_strided_slice %205 {offsets = [14, 0], sizes = [2, 256], strides = [1, 1]} : vector<16x256xf32> to vector<2x256xf32>
    %cst_72 = arith.constant dense<0.000000e+00> : vector<2x256xf32>
    %328 = tpu.matmul %326, %183, %cst_72 {dimension_numbers = #tpu.dot_dimension_numbers<[1], [0], [0], [1], [0, 0, 1, 1], [], []>} : vector<2x64xf32>, vector<64x256xf32>, vector<2x256xf32> -> vector<2x256xf32>
    %329 = arith.addf %327, %328 : vector<2x256xf32>
    %330 = math.tanh %329 : vector<2x256xf32>
    %331 = vector.broadcast %0 : vector<1x256xf32> to vector<2x256xf32>
    %332 = arith.mulf %330, %331 : vector<2x256xf32>
    %333 = vector.broadcast %2 : vector<1x256xf32> to vector<2x256xf32>
    %334 = arith.addf %332, %333 : vector<2x256xf32>
    %335 = vector.extract_strided_slice %334 {offsets = [0, 0], sizes = [2, 64], strides = [1, 1]} : vector<2x256xf32> to vector<2x64xf32>
    %336 = vector.extract_strided_slice %334 {offsets = [0, 64], sizes = [2, 64], strides = [1, 1]} : vector<2x256xf32> to vector<2x64xf32>
    %337 = vector.extract_strided_slice %334 {offsets = [0, 128], sizes = [2, 64], strides = [1, 1]} : vector<2x256xf32> to vector<2x64xf32>
    %338 = vector.extract_strided_slice %334 {offsets = [0, 192], sizes = [2, 64], strides = [1, 1]} : vector<2x256xf32> to vector<2x64xf32>
    %339 = arith.mulf %336, %324 : vector<2x64xf32>
    %340 = arith.mulf %335, %337 : vector<2x64xf32>
    %341 = arith.addf %339, %340 : vector<2x64xf32>
    %342 = math.tanh %341 : vector<2x64xf32>
    %343 = arith.mulf %338, %342 : vector<2x64xf32>
    %c0_73 = arith.constant 0 : index
    %c0_74 = arith.constant 0 : index
    %344 = vector.load %arg11[%c0_73, %c0_74] : memref<64x1xf32, #tpu.memory_space<vmem>>, vector<64x1xf32>
    %cst_75 = arith.constant dense<0.000000e+00> : vector<2x1xf32>
    %345 = tpu.matmul %343, %344, %cst_75 {dimension_numbers = #tpu.dot_dimension_numbers<[1], [0], [0], [1], [0, 0, 1, 1], [], []>} : vector<2x64xf32>, vector<64x1xf32>, vector<2x1xf32> -> vector<2x1xf32>
    %c0_76 = arith.constant 0 : index
    %c0_77 = arith.constant 0 : index
    %346 = vector.load %arg12[%c0_76, %c0_77] : memref<64x1xf32, #tpu.memory_space<vmem>>, vector<64x1xf32>
    %cst_78 = arith.constant dense<0.000000e+00> : vector<2x1xf32>
    %347 = tpu.matmul %224, %346, %cst_78 {dimension_numbers = #tpu.dot_dimension_numbers<[1], [0], [0], [1], [0, 0, 1, 1], [], []>} : vector<2x64xf32>, vector<64x1xf32>, vector<2x1xf32> -> vector<2x1xf32>
    %348 = arith.addf %345, %347 : vector<2x1xf32>
    %c0_79 = arith.constant 0 : index
    %c0_80 = arith.constant 0 : index
    %349 = vector.load %arg13[%c0_79, %c0_80] : memref<1x1xf32, #tpu.memory_space<vmem>>, vector<1x1xf32>
    %350 = vector.broadcast %349 : vector<1x1xf32> to vector<2x1xf32>
    %351 = arith.addf %348, %350 : vector<2x1xf32>
    %352 = arith.negf %351 : vector<2x1xf32>
    %353 = math.exp %352 : vector<2x1xf32>
    %cst_81 = arith.constant 1.000000e+00 : f32
    %354 = vector.broadcast %cst_81 : f32 to vector<2x1xf32>
    %355 = arith.addf %354, %353 : vector<2x1xf32>
    %356 = arith.divf %354, %355 : vector<2x1xf32>
    %c0_82 = arith.constant 0 : index
    %c0_83 = arith.constant 0 : index
    %357 = vector.load %arg14[%c0_82, %c0_83] : memref<2x1xf32, #tpu.memory_space<vmem>>, vector<2x1xf32>
    tpu.vector_store %arg14[%c0_82, %c0_83], %356 {strides = array<i32>} : memref<2x1xf32, #tpu.memory_space<vmem>>, vector<2x1xf32>,
    return
  }
}

</mosaic_0001>

<bundles_post_ra>
// kernel: _lambda_.1
= control target key start
LH: loop header
LB: loop body
LE: loop exit
PB: predicated region body
PF: predicated region fallthrough
CT: control target
= control target key end

     0   :  { %s3587_s0 = inlined_call_operand.vmem [shape: f32[16,16], index: 0, kind: input, shape index: {}]   ;;  %s3588_s1 = inlined_call_operand.vmem [shape: f32[1,256], index: 1, kind: input, shape index: {}]   ;;  %s3589_s2 = inlined_call_operand.vmem [shape: f32[1,256], index: 2, kind: input, shape index: {}]   ;;  %s3590_s3 = inlined_call_operand.vmem [shape: f32[1,256], index: 3, kind: input, shape index: {}]   ;;  %s3591_s4 = inlined_call_operand.vmem [shape: f32[16,256], index: 4, kind: input, shape index: {}]   ;;  %s3592_s5 = inlined_call_operand.hbm [shape: f32[64,256], index: 5, kind: input, shape index: {}]   ;;  %s3593_s6 = inlined_call_operand.vmem [shape: f32[1,256], index: 6, kind: input, shape index: {}]   ;;  %s3594_s7 = inlined_call_operand.hbm [shape: f32[64,256], index: 7, kind: input, shape index: {}]   ;;  %s3595_s8 = inlined_call_operand.hbm [shape: f32[64,256], index: 8, kind: input, shape index: {}]   ;;  %s3596_s9 = inlined_call_operand.hbm [shape: f32[64,256], index: 9, kind: input, shape index: {}]   ;;  %s3597_s10 = inlined_call_operand.vmem [shape: f32[1,256], index: 10, kind: input, shape index: {}]   ;;  %s3598_s11 = inlined_call_operand.hbm [shape: f32[64,1], index: 11, kind: input, shape index: {}]   ;;  %s3599_s12 = inlined_call_operand.hbm [shape: f32[64,1], index: 12, kind: input, shape index: {}]   ;;  %s3600_s13 = inlined_call_operand.<no memory space> [shape: f32[1,1], index: 13, kind: input, shape index: {}]   ;;  %s3601_s14 = inlined_call_operand.vmem [shape: f32[2,1], index: 14, kind: output, shape index: {}]  }
   0x1   :  { %v19_v0 = vstv %s3600_s13 }
   0x2   :  { %20 = vst [vmem:[#allocation4] sm:$0x1] %v19_v0 }
   0x3   :  { %21 = vsyncpa [#allocation6], 0 }
   0x4   :  { %22 = vsyncpa [#allocation8], 0 }
   0x5   :  { %23 = vsyncpa [#allocation11], 0 }
   0x6   :  { %24 = vsyncpa [#allocation14], 0  ;;  %s2776_s15 = smov [#allocation7]   ;;  %s2777_s17 = smov [#allocation10]  }
   0x7   :  { %s54_s16 = sshll.u32 %s2776_s15, 4  ;;  %s78_s18 = sshll.u32 %s2777_s17, 4  ;;  %s55_s16 = int_to_ptr.vmem [resolvable:$true] %s54_s16  ;;  %s79_s18 = int_to_ptr.vmem [resolvable:$true] %s78_s18 }
   0x8   :  { %s2656_s19 = scalar_lea.vmem %s55_s16, 2048  ;;  %p2661_p1 = scmp.lt.s32.totalorder %s55_s16, %s55_s16 }
   0x9   :  { %p2657_p0 = scmp.ne.s32.totalorder %s55_s16, %s2656_s19  ;;  %p2662_p2 = scmp.lt.s32.totalorder %s2656_s19, %s2656_s19 }
   0xb   :  { %p2663_p3 = por %p2662_p2, %p2661_p1 }
   0xd   :  { %p2664_p4 = pnand %p2663_p3, %p2657_p0 }
   0xf   :  { %2667 = shalt.err (!%p2664_p4)
}
  0x10   :  { %s2778_s20 = smov 256   ;;  %s2779_s13 = smov 16  }
  0x11   :  { %60 = dma.hbm_to_vmem [thread:$0]  %s3594_s7, 2048, %s55_s16, [#allocation8], %s2778_s20, %s2778_s20, %s2779_s13  }
  0x12   :  { %s2676_s23 = scalar_lea.vmem %s79_s18, 2048  ;;  %p2681_p6 = scmp.lt.s32.totalorder %s79_s18, %s79_s18 }
  0x13   :  { %p2677_p5 = scmp.ne.s32.totalorder %s79_s18, %s2676_s23  ;;  %p2682_p7 = scmp.lt.s32.totalorder %s2676_s23, %s2676_s23 }
  0x15   :  { %p2683_p8 = por %p2682_p7, %p2681_p6 }
  0x17   :  { %p2684_p9 = pnand %p2683_p8, %p2677_p5 }
  0x19   :  { %2687 = shalt.err (!%p2684_p9)
}
  0x1a   :  { %84 = dma.hbm_to_vmem [thread:$0]  %s3596_s9, 2048, %s79_s18, [#allocation11], %s2778_s20, %s2778_s20, %s2779_s13  }
  0x1b   :  { %s2780_s26 = smov [#allocation5]   ;;  %s2781_s28 = smov [#allocation9]  }
  0x1c   :  { %s40_s27 = sshll.u32 %s2780_s26, 4  ;;  %s66_s29 = sshll.u32 %s2781_s28, 4  ;;  %s41_s27 = int_to_ptr.vmem [resolvable:$true] %s40_s27  ;;  %s67_s29 = int_to_ptr.vmem [resolvable:$true] %s66_s29 }
  0x1d   :  { %s2696_s7 = scalar_lea.vmem %s41_s27, 2048  ;;  %p2701_p11 = scmp.lt.s32.totalorder %s41_s27, %s41_s27 }
  0x1e   :  { %p2697_p10 = scmp.ne.s32.totalorder %s41_s27, %s2696_s7  ;;  %p2702_p12 = scmp.lt.s32.totalorder %s2696_s7, %s2696_s7 }
  0x20   :  { %p2703_p13 = por %p2702_p12, %p2701_p11 }
  0x22   :  { %p2704_p0 = pnand %p2703_p13, %p2697_p10 }
  0x24   :  { %2707 = shalt.err (!%p2704_p0)
}
  0x25   :  { %46 = dma.hbm_to_vmem [thread:$0]  %s3592_s5, 2048, %s41_s27, [#allocation6], %s2778_s20, %s2778_s20, %s2779_s13  }
  0x26   :  { %s2716_s9 = scalar_lea.vmem %s67_s29, 2048  ;;  %p2721_p2 = scmp.lt.s32.totalorder %s67_s29, %s67_s29 }
  0x27   :  { %p2717_p1 = scmp.ne.s32.totalorder %s67_s29, %s2716_s9  ;;  %p2722_p3 = scmp.lt.s32.totalorder %s2716_s9, %s2716_s9 }
  0x29   :  { %p2723_p4 = por %p2722_p3, %p2721_p2 }
  0x2b   :  { %p2724_p5 = pnand %p2723_p4, %p2717_p1 }
  0x2d   :  { %2727 = shalt.err (!%p2724_p5)
}
  0x2e   :  { %72 = dma.hbm_to_vmem [thread:$0]  %s3595_s8, 2048, %s67_s29, [#allocation8], %s2778_s20, %s2778_s20, %s2779_s13  }
  0x2f   :  { %s2782_s18 = smov [#allocation12]  }
  0x30   :  { %s92_s19 = sshll.u32 %s2782_s18, 4  ;;  %s93_s19 = int_to_ptr.vmem [resolvable:$true] %s92_s19 }
  0x31   :  { %s2736_s21 = scalar_lea.vmem %s93_s19, 1024  ;;  %p2741_p7 = scmp.lt.s32.totalorder %s93_s19, %s93_s19 }
  0x32   :  { %p2737_p6 = scmp.ne.s32.totalorder %s93_s19, %s2736_s21  ;;  %p2742_p8 = scmp.lt.s32.totalorder %s2736_s21, %s2736_s21 }
  0x34   :  { %p2743_p9 = por %p2742_p8, %p2741_p7 }
  0x36   :  { %p2744_p10 = pnand %p2743_p9, %p2737_p6 }
  0x38   :  { %2747 = shalt.err (!%p2744_p10)
}
  0x39   :  { %s2783_s5 = smov 128   ;;  %s2784_s22 = smov 8  }
  0x3a   :  { %98 = dma.hbm_to_vmem [thread:$0]  %s3598_s11, 1024, %s93_s19, [#allocation11], %s2783_s5, %s2783_s5, %s2784_s22  }
  0x3b   :  { %s2785_s25 = smov [#allocation13]  }
  0x3c   :  { %s104_s26 = sshll.u32 %s2785_s25, 4  ;;  %s105_s26 = int_to_ptr.vmem [resolvable:$true] %s104_s26 }
  0x3d   :  { %s2756_s8 = scalar_lea.vmem %s105_s26, 1024  ;;  %p2761_p12 = scmp.lt.s32.totalorder %s105_s26, %s105_s26 }
  0x3e   :  { %p2757_p11 = scmp.ne.s32.totalorder %s105_s26, %s2756_s8  ;;  %p2762_p13 = scmp.lt.s32.totalorder %s2756_s8, %s2756_s8 }
  0x40   :  { %p2763_p0 = por %p2762_p13, %p2761_p12 }
  0x42   :  { %p2764_p1 = pnand %p2763_p0, %p2757_p11 }
  0x44   :  { %2767 = shalt.err (!%p2764_p1)
}
  0x45   :  { %110 = dma.hbm_to_vmem [thread:$0]  %s3599_s12, 1024, %s105_s26, [#allocation14], %s2783_s5, %s2783_s5, %s2784_s22  }
  0x46   :  { %2768 = dma.done.wait [#allocation6], 2048  }
  0x47   :  { %2769 = vsyncadd [#allocation6], 4294965248 }
  0x48   :  { %2770 = dma.done.wait [#allocation8], 4096  }
  0x49   :  { %2771 = vsyncadd [#allocation8], 4294963200 }
  0x4a   :  { %2772 = dma.done.wait [#allocation11], 3072  }
  0x4b   :  { %2773 = vsyncadd [#allocation11], 4294964224 }
  0x4c   :  { %2774 = dma.done.wait [#allocation14], 1024  }
  0x4d   :  { %2775 = vsyncadd [#allocation14], 4294966272  ;;  %v2786_v1 = vmov 0.0   ;;  %v138_v2 = vld [vmem:[%s3591_s4 + $0x18] sm:$0xff]  ;;  %v137_v3 = vld [vmem:[%s3591_s4 + $0x10] sm:$0xff]  ;;  %vm169_vm0 = vcmask 130048   ;;  %v159_v24 = vlaneseq }
  0x4e   :  { %240 = vmatprep.mubr.f32.mxu0 %v2786_v1  ;;  %390 = vmatprep.mubr.f32.mxu1 %v2786_v1  ;;  %v2905_v4 = vld [vmem:[#allocation5 + $0x78] sm:$0xff]  ;;  %v136_v5 = vld [vmem:[%s3591_s4 + $0x8] sm:$0xff]  ;;  %v2911_v6 = vld [vmem:[#allocation5 + $0x70] sm:$0xff]  ;;  %vm273_vm1 = vcmask 1041408   ;;  %vm276_vm2 = vcmask 1043456   ;;  %vm279_vm3 = vcmask 1045504  }
  0x4f   :  { %204 = vmatprep.subr.mxu0 %v138_v2  ;;  %342 = vmatprep.subr.mxu1 %v2905_v4  ;;  %v135_v7 = vld [vmem:[%s3591_s4] sm:$0xff]  ;;  %v2917_v8 = vld [vmem:[#allocation5 + $0x68] sm:$0xff]  ;;  %v2927_v12 = vld [vmem:[#allocation5 + $0x50] sm:$0xff]  ;;  %v160_v25 = vshrl.u32 %v159_v24, 7  ;;  %vm440_vm4 = vcmask 517120   ;;  %vm322_vm5 = vcmask 523264  }
  0x50   :  { %205 = vmatpush1.msra.mxu0 %v137_v3  ;;  %343 = vmatpush1.msra.mxu1 %v2911_v6  ;;  %v156_v9 = vld [vmem:[%s3587_s0] sm:$0xff]  ;;  %v2930_v13 = vld [vmem:[#allocation5 + $0x48] sm:$0xff]  ;;  %v2944_v17 = vld [vmem:[#allocation5 + $0x30] sm:$0xff]  ;;  %vm546_vm6 = vcmask 519170   ;;  %vm764_vm7 = vcmask 523270   ;;  %vm655_vm8 = vcmask 521220  }
  0x51   :  { %v2922_v10 = vld [vmem:[#allocation5 + $0x60] sm:$0xff]  ;;  %206 = vmatprep.subr.mxu0 %v136_v5  ;;  %344 = vmatprep.subr.mxu1 %v2917_v8  ;;  %v2925_v11 = vld [vmem:[#allocation5 + $0x58] sm:$0xff]  ;;  %v2948_v18 = vld [vmem:[#allocation5 + $0x28] sm:$0xff]  ;;  %v3005_v26 = vsub.s32 0, %v160_v25  ;;  %v3010_v28 = vsub.s32 1, %v160_v25  ;;  %vm2788_vm9 = vmmov 0  }
  0x52   :  { %207 = vmatpush1.msra.mxu0 %v135_v7  ;;  %345 = vmatpush1.msra.mxu1 %v2922_v10  ;;  %v2934_v14 = vld [vmem:[#allocation5 + $0x40] sm:$0xff]  ;;  %v2941_v16 = vld [vmem:[#allocation5 + $0x38] sm:$0xff]  ;;  %v2960_v21 = vld [vmem:[#allocation5 + $0x10] sm:$0xff]  ;;  %vm2445_vm10 = vcmask 1024  }
  0x53   :  { %2455 = vmatmul.mubr.msk.f32.vlgmr.msra.gmra.mxu0 %vm169_vm0, %v156_v9  ;;  %346 = vmatprep.subr.mxu1 %v2925_v11  ;;  %v157_v15 = vld [vmem:[%s3587_s0 + $0x8] sm:$0xff]  ;;  %v2956_v20 = vld [vmem:[#allocation5 + $0x18] sm:$0xff] }
  0x54   :  { %347 = vmatpush1.msra.mxu1 %v2927_v12  ;;  %246 = vmatprep.mubr.f32.mxu0 %v2786_v1  ;;  %v2953_v19 = vld [vmem:[#allocation5 + $0x20] sm:$0xff]  ;;  %v2964_v22 = vld [vmem:[#allocation5 + $0x8] sm:$0xff] }
  0x55   :  { %348 = vmatprep.subr.mxu1 %v2930_v13  ;;  %461 = vmatprep.subr.mxu0 %v2905_v4  ;;  %v2968_v23 = vld [vmem:[#allocation5] sm:$0xff] }
  0x56   :  { %349 = vmatpush1.msra.mxu1 %v2934_v14  ;;  %462 = vmatpush1.msra.mxu0 %v2911_v6  ;;  %v155_v27 = vld [vmem:[%s3593_s6] sm:$0x3] }
  0x57   :  { %2456 = vmatmul.mubr.msk.f32.gmra.mxu0 %vm169_vm0, %v157_v15  ;;  %350 = vmatprep.subr.mxu1 %v2941_v16  ;;  %v162_v29 = vrot.slane %v155_v27, %v3005_v26  ;;  %v166_v30 = vrot.slane %v155_v27, %v3010_v28  ;;  %v133_v31 = vld [vmem:[%s3590_s3] sm:$0x3] }
  0x58   :  { %351 = vmatpush1.msra.mxu1 %v2944_v17  ;;  %463 = vmatprep.subr.mxu0 %v2917_v8  ;;  %v134_v33 = vsub.f32 1.0, %v133_v31  ;;  %v3023_v45 = vrot.slane %v133_v31, %v3005_v26  ;;  %v3031_v51 = vrot.slane %v133_v31, %v3010_v28 }
  0x59   :  { %352 = vmatprep.subr.mxu1 %v2948_v18  ;;  %464 = vmatpush1.msra.mxu0 %v2922_v10 }
  0x5a   :  { %353 = vmatpush1.msra.mxu1 %v2953_v19  ;;  %465 = vmatprep.subr.mxu0 %v2925_v11  ;;  %v3019_v43 = vrot.slane %v134_v33, %v3005_v26  ;;  %v3026_v48 = vrot.slane %v134_v33, %v3010_v28 }
  0x5b   :  { %354 = vmatprep.subr.mxu1 %v2956_v20  ;;  %466 = vmatpush1.msra.mxu0 %v2927_v12 }
  0x5c   :  { %355 = vmatpush1.msra.mxu1 %v2960_v21  ;;  %467 = vmatprep.subr.mxu0 %v2930_v13 }
  0x5d   :  { %356 = vmatprep.subr.mxu1 %v2964_v22  ;;  %468 = vmatpush1.msra.mxu0 %v2934_v14 }
  0x5e   :  { %357 = vmatpush1.msra.mxu1 %v2968_v23  ;;  %469 = vmatprep.subr.mxu0 %v2941_v16 }
  0x5f   :  { %391 = vmatmul.mubr.f32.vlgmr.msra.gmra.mxu1 %v2786_v1  ;;  %470 = vmatpush1.msra.mxu0 %v2944_v17 }
  0x60   :  { %471 = vmatprep.subr.mxu0 %v2948_v18  ;;  %509 = vmatprep.mubr.f32.mxu0 %v2786_v1 }
  0x61   :  { %472 = vmatpush1.msra.mxu0 %v2953_v19  ;;  %570 = vmatprep.subr.mxu1 %v2905_v4 }
  0x62   :  { %473 = vmatprep.subr.mxu0 %v2956_v20  ;;  %571 = vmatpush1.msra.mxu1 %v2911_v6 }
  0x63   :  { %474 = vmatpush1.msra.mxu0 %v2960_v21  ;;  %572 = vmatprep.subr.mxu1 %v2917_v8 }
  0x64   :  { %475 = vmatprep.subr.mxu0 %v2964_v22  ;;  %573 = vmatpush1.msra.mxu1 %v2922_v10 }
  0x65   :  { %476 = vmatpush1.msra.mxu0 %v2968_v23  ;;  %574 = vmatprep.subr.mxu1 %v2925_v11 }
  0x66   :  { %575 = vmatpush1.msra.mxu1 %v2927_v12  ;;  %618 = vmatprep.mubr.f32.mxu1 %v2786_v1 }
  0x67   :  { %576 = vmatprep.subr.mxu1 %v2930_v13  ;;  %679 = vmatprep.subr.mxu0 %v2905_v4 }
  0x68   :  { %577 = vmatpush1.msra.mxu1 %v2934_v14 }
  0x69   :  { %578 = vmatprep.subr.mxu1 %v2941_v16 }
  0x6a   :  { %579 = vmatpush1.msra.mxu1 %v2944_v17 }
  0x6b   :  { %580 = vmatprep.subr.mxu1 %v2948_v18 }
  0x6c   :  { %581 = vmatpush1.msra.mxu1 %v2953_v19 }
  0x6d   :  { %582 = vmatprep.subr.mxu1 %v2956_v20 }
  0x6e   :  { %583 = vmatpush1.msra.mxu1 %v2960_v21 }
  0x6f   :  { %584 = vmatprep.subr.mxu1 %v2964_v22 }
  0x70   :  { %585 = vmatpush1.msra.mxu1 %v2968_v23 }
  0x71   :  { %788 = vmatprep.subr.mxu1 %v2905_v4 }
 0x113   :  { %v242_v32 = vpop.f32.mrf.mxu0 }
 0x114   :  { %v243_v34 = vadd.f32 %v242_v32, %v162_v29 }
 0x115   :  { %v244_v35 = vpop.f32.mrf.mxu0 }
 0x116   :  { %v265_v36 = vrot.slane %v243_v34, 6  ;;  %v269_v37 = vrot.slane %v243_v34, 2  ;;  %v245_v38 = vadd.f32 %v244_v35, %v166_v30  ;;  %v299_v15 = vmul.f32 %v3023_v45, %v243_v34  ;;  %v131_v34 = vld [vmem:[%s3588_s1] sm:$0x3]  ;;  %s2787_s1 = smov 64  }
 0x117   :  { %v248_v39 = vpop.f32.mrf.mxu0 }
 0x118   :  { %v282_v40 = vsel %vm273_vm1, %v265_v36, %v269_v37  ;;  %v266_v41 = vrot.slane %v245_v38, 6  ;;  %v270_v42 = vrot.slane %v245_v38, 2  ;;  %v249_v46 = vadd.f32 %v248_v39, %v162_v29 }
 0x119   :  { %v284_v44 = vsel %vm276_vm2, %v282_v40, %v265_v36  ;;  %v250_v47 = vpop.f32.mrf.mxu0  ;;  %v300_v29 = vmul.f32 %v3031_v51, %v245_v38  ;;  %v3066_v38 = vrot.slane %v131_v34, %v3005_v26  ;;  %v3069_v39 = vrot.slane %v131_v34, %v3010_v28 }
 0x11a   :  { %v286_v49 = vsel %vm279_vm3, %v284_v44, %v269_v37  ;;  %v283_v50 = vsel %vm273_vm1, %v266_v41, %v270_v42  ;;  %v251_v52 = vadd.f32 %v250_v47, %v166_v30  ;;  %v255_v54 = vrot.slane %v249_v46, 6  ;;  %v132_v37 = vld [vmem:[%s3589_s2] sm:$0x3] }
 0x11b   :  { %v285_v53 = vsel %vm276_vm2, %v283_v50, %v266_v41  ;;  %v259_v55 = vrot.slane %v249_v46, 2  ;;  %v301_v56 = vmul.f32 %v3023_v45, %v249_v46  ;;  %v316_v58 = vmul.f32 %v3019_v43, %v286_v49 }
 0x11c   :  { %v287_v57 = vsel %vm279_vm3, %v285_v53, %v270_v42  ;;  %v256_v59 = vrot.slane %v251_v52, 6  ;;  %v260_v60 = vrot.slane %v251_v52, 2  ;;  %v302_v62 = vmul.f32 %v3031_v51, %v251_v52 }
 0x11d   :  { %v274_v61 = vsel %vm273_vm1, %v255_v54, %v259_v55  ;;  %v317_v63 = vmul.f32 %v3026_v48, %v287_v57  ;;  %v3041_v2 = vadd.f32 %v316_v58, %v301_v56  ;;  %v3072_v41 = vrot.slane %v132_v37, %v3005_v26 }
 0x11e   :  { %v277_v0 = vsel %vm276_vm2, %v274_v61, %v255_v54  ;;  %v275_v3 = vsel %vm273_vm1, %v256_v59, %v260_v60  ;;  %v3075_v42 = vrot.slane %v132_v37, %v3010_v28 }
 0x11f   :  { %v280_v5 = vsel %vm279_vm3, %v277_v0, %v259_v55  ;;  %v278_v7 = vsel %vm276_vm2, %v275_v3, %v256_v59  ;;  %v3046_v9 = vadd.f32 %v317_v63, %v302_v62  ;;  %v392_v27 = vpop.f32.mrf.mxu1 }
 0x120   :  { %v281_v24 = vsel %vm279_vm3, %v278_v7, %v260_v60  ;;  %v314_v25 = vmul.f32 %v3019_v43, %v280_v5 }
 0x121   :  { %v315_v30 = vmul.f32 %v3026_v48, %v281_v24  ;;  %v394_v35 = vpop.f32.mrf.mxu1 }
 0x122   :  { %v3053_v31 = vadd.f32 %v314_v25, %v299_v15 }
 0x123   :  { %v3055_v32 = vadd.f32 %v315_v30, %v300_v29 }
 0x124   :  { %v397_v33 = vadd.f32 %v392_v27, %v3053_v31 }
 0x125   :  { %v398_v36 = vadd.f32 %v394_v35, %v3055_v32 }
 0x126   :  { %2548 = vtanh.f32 %v397_v33 }
 0x127   :  { %2550 = vtanh.f32 %v398_v36 }
 0x133   :  { %v2549_v40 = vpop.eup %2548 }
 0x134   :  { %v2551_v44 = vpop.eup %2550  ;;  %v412_v46 = vmul.f32 %v2549_v40, %v3066_v38 }
 0x135   :  { %v413_v47 = vmul.f32 %v2551_v44, %v3069_v39 }
 0x136   :  { %v425_v49 = vadd.f32 %v3072_v41, %v412_v46 }
 0x137   :  { %v426_v50 = vadd.f32 %v3075_v42, %v413_v47 }
 0x138   :  { %v427_v53 = vmul.f32 0.0, %v425_v49 }
 0x139   :  { %v428_v52 = vmul.f32 %v426_v50, %v425_v49 }
 0x13b   :  { %430 = vrot.lane.b32.xlu0 %v428_v52, %s2787_s1 }
 0x1ad   :  { %v431_v54 = vpop.permute.xlu0 %430 }
 0x1ae   :  { %v433_v55 = vadd.f32 %v431_v54, %v427_v53 }
 0x1b0   :  { %2552 = vtanh.f32 %v433_v55  ;;  %v531_v15 = vrot.slane %v433_v55, 6 }
 0x1bd   :  { %v2553_v56 = vpop.eup %2552 }
 0x1be   :  { %v435_v57 = vmul.f32 %v2553_v56, %v426_v50 }
 0x1c0   :  { %437 = vrot.lane.b32.xlu0 %v435_v57, %s2787_s1 }
 0x232   :  { %v438_v58 = vpop.permute.xlu0 %437 }
 0x233   :  { %441 = vst.msk [vmem:[#allocation2] sm:$0x3] %vm440_vm4, %v438_v58  ;;  %442 = vst.msk [vmem:[#allocation3 + $0xe] sm:$0x3] %vm440_vm4, %v438_v58  ;;  %2457 = vmatmul.mubr.msk.f32.vlgmr.msra.gmra.mxu0 %vm322_vm5, %v438_v58 }
 0x234   :  { %680 = vmatpush1.msra.mxu0 %v2911_v6  ;;  %727 = vmatprep.mubr.f32.mxu0 %v2786_v1 }
 0x235   :  { %681 = vmatprep.subr.mxu0 %v2917_v8 }
 0x236   :  { %682 = vmatpush1.msra.mxu0 %v2922_v10 }
 0x237   :  { %683 = vmatprep.subr.mxu0 %v2925_v11 }
 0x238   :  { %684 = vmatpush1.msra.mxu0 %v2927_v12 }
 0x239   :  { %685 = vmatprep.subr.mxu0 %v2930_v13 }
 0x23a   :  { %686 = vmatpush1.msra.mxu0 %v2934_v14 }
 0x23b   :  { %687 = vmatprep.subr.mxu0 %v2941_v16 }
 0x23c   :  { %688 = vmatpush1.msra.mxu0 %v2944_v17 }
 0x23d   :  { %689 = vmatprep.subr.mxu0 %v2948_v18 }
 0x23e   :  { %690 = vmatpush1.msra.mxu0 %v2953_v19 }
 0x23f   :  { %691 = vmatprep.subr.mxu0 %v2956_v20 }
 0x240   :  { %692 = vmatpush1.msra.mxu0 %v2960_v21 }
 0x241   :  { %693 = vmatprep.subr.mxu0 %v2964_v22 }
 0x242   :  { %694 = vmatpush1.msra.mxu0 %v2968_v23 }
 0x243   :  { %887 = vmatprep.subr.mxu0 %v2905_v4 }
 0x2f3   :  { %v511_v59 = vpop.f32.mrf.mxu0 }
 0x2f4   :  { %v518_v60 = vrot.slane %v511_v59, 6 }
 0x2f5   :  { %v513_v61 = vpop.f32.mrf.mxu0 }
 0x2f6   :  { %v522_v62 = vadd.f32 %v518_v60, %v3053_v31  ;;  %v519_v63 = vrot.slane %v513_v61, 6 }
 0x2f8   :  { %2554 = vtanh.f32 %v522_v62  ;;  %v523_v0 = vadd.f32 %v519_v63, %v3055_v32 }
 0x2fa   :  { %2556 = vtanh.f32 %v523_v0 }
 0x305   :  { %v2555_v3 = vpop.eup %2554 }
 0x306   :  { %v526_v5 = vmul.f32 %v2555_v3, %v3066_v38 }
 0x307   :  { %v2557_v7 = vpop.eup %2556 }
 0x308   :  { %v527_v24 = vmul.f32 %v2557_v7, %v3069_v39  ;;  %v528_v25 = vadd.f32 %v526_v5, %v3072_v41 }
 0x30a   :  { %v529_v27 = vadd.f32 %v527_v24, %v3075_v42  ;;  %v533_v29 = vmul.f32 %v531_v15, %v528_v25 }
 0x30c   :  { %v534_v30 = vmul.f32 %v529_v27, %v528_v25 }
 0x30e   :  { %536 = vrot.lane.b32.xlu1 %v534_v30, %s2787_s1 }
 0x380   :  { %v537_v33 = vpop.permute.xlu1 %536 }
 0x381   :  { %v539_v35 = vadd.f32 %v537_v33, %v533_v29 }
 0x383   :  { %2558 = vtanh.f32 %v539_v35  ;;  %v640_v56 = vrot.slane %v539_v35, 6 }
 0x390   :  { %v2559_v36 = vpop.eup %2558 }
 0x391   :  { %v3110_v34 = vmul.f32 %v2559_v36, %v529_v27 }
 0x393   :  { %v549_v37 = vrot.slane %v3110_v34, 2 }
 0x395   :  { %550 = vrot.lane.b32.xlu1 %v549_v37, %s2787_s1 }
 0x407   :  { %v551_v40 = vpop.permute.xlu1 %550 }
 0x408   :  { %2458 = vmatmul.mubr.msk.f32.vlgmr.msra.gmra.mxu1 %vm322_vm5, %v551_v40 }
 0x409   :  { %789 = vmatpush1.msra.mxu1 %v2911_v6  ;;  %836 = vmatprep.mubr.f32.mxu1 %v2786_v1 }
 0x40a   :  { %790 = vmatprep.subr.mxu1 %v2917_v8 }
 0x40b   :  { %791 = vmatpush1.msra.mxu1 %v2922_v10 }
 0x40c   :  { %792 = vmatprep.subr.mxu1 %v2925_v11 }
 0x40d   :  { %793 = vmatpush1.msra.mxu1 %v2927_v12 }
 0x40e   :  { %794 = vmatprep.subr.mxu1 %v2930_v13 }
 0x40f   :  { %795 = vmatpush1.msra.mxu1 %v2934_v14 }
 0x410   :  { %796 = vmatprep.subr.mxu1 %v2941_v16 }
 0x411   :  { %797 = vmatpush1.msra.mxu1 %v2944_v17 }
 0x412   :  { %798 = vmatprep.subr.mxu1 %v2948_v18 }
 0x413   :  { %799 = vmatpush1.msra.mxu1 %v2953_v19 }
 0x414   :  { %800 = vmatprep.subr.mxu1 %v2956_v20 }
 0x415   :  { %801 = vmatpush1.msra.mxu1 %v2960_v21 }
 0x416   :  { %802 = vmatprep.subr.mxu1 %v2964_v22 }
 0x417   :  { %803 = vmatpush1.msra.mxu1 %v2968_v23 }
 0x418   :  { %995 = vmatprep.subr.mxu1 %v2905_v4 }
 0x4c8   :  { %v620_v44 = vpop.f32.mrf.mxu1 }
 0x4c9   :  { %v627_v46 = vrot.slane %v620_v44, 4 }
 0x4ca   :  { %v622_v47 = vpop.f32.mrf.mxu1 }
 0x4cb   :  { %v631_v49 = vadd.f32 %v627_v46, %v3053_v31  ;;  %v628_v50 = vrot.slane %v622_v47, 4 }
 0x4cd   :  { %2560 = vtanh.f32 %v631_v49  ;;  %v632_v52 = vadd.f32 %v628_v50, %v3055_v32 }
 0x4cf   :  { %2562 = vtanh.f32 %v632_v52 }
 0x4da   :  { %v2561_v53 = vpop.eup %2560 }
 0x4db   :  { %v635_v54 = vmul.f32 %v2561_v53, %v3066_v38 }
 0x4dc   :  { %v2563_v55 = vpop.eup %2562 }
 0x4dd   :  { %v636_v57 = vmul.f32 %v2563_v55, %v3069_v39  ;;  %v637_v58 = vadd.f32 %v635_v54, %v3072_v41 }
 0x4df   :  { %v638_v59 = vadd.f32 %v636_v57, %v3075_v42  ;;  %v642_v60 = vmul.f32 %v640_v56, %v637_v58 }
 0x4e1   :  { %v643_v61 = vmul.f32 %v638_v59, %v637_v58 }
 0x4e3   :  { %645 = vrot.lane.b32.xlu0 %v643_v61, %s2787_s1 }
 0x555   :  { %v646_v62 = vpop.permute.xlu0 %645 }
 0x556   :  { %v648_v63 = vadd.f32 %v646_v62, %v642_v60 }
 0x558   :  { %2564 = vtanh.f32 %v648_v63  ;;  %v749_v37 = vrot.slane %v648_v63, 6 }
 0x565   :  { %v2565_v0 = vpop.eup %2564 }
 0x566   :  { %v3139_v3 = vmul.f32 %v2565_v0, %v638_v59 }
 0x568   :  { %v658_v5 = vrot.slane %v3139_v3, 4 }
 0x56a   :  { %659 = vrot.lane.b32.xlu1 %v658_v5, %s2787_s1 }
 0x5dc   :  { %v660_v7 = vpop.permute.xlu1 %659 }
 0x5dd   :  { %2459 = vmatmul.mubr.msk.f32.vlgmr.msra.gmra.mxu0 %vm322_vm5, %v660_v7 }
 0x5de   :  { %888 = vmatpush1.msra.mxu0 %v2911_v6  ;;  %935 = vmatprep.mubr.f32.mxu0 %v2786_v1 }
 0x5df   :  { %889 = vmatprep.subr.mxu0 %v2917_v8 }
 0x5e0   :  { %890 = vmatpush1.msra.mxu0 %v2922_v10 }
 0x5e1   :  { %891 = vmatprep.subr.mxu0 %v2925_v11 }
 0x5e2   :  { %892 = vmatpush1.msra.mxu0 %v2927_v12 }
 0x5e3   :  { %893 = vmatprep.subr.mxu0 %v2930_v13 }
 0x5e4   :  { %894 = vmatpush1.msra.mxu0 %v2934_v14 }
 0x5e5   :  { %895 = vmatprep.subr.mxu0 %v2941_v16 }
 0x5e6   :  { %896 = vmatpush1.msra.mxu0 %v2944_v17 }
 0x5e7   :  { %897 = vmatprep.subr.mxu0 %v2948_v18 }
 0x5e8   :  { %898 = vmatpush1.msra.mxu0 %v2953_v19 }
 0x5e9   :  { %899 = vmatprep.subr.mxu0 %v2956_v20 }
 0x5ea   :  { %900 = vmatpush1.msra.mxu0 %v2960_v21 }
 0x5eb   :  { %901 = vmatprep.subr.mxu0 %v2964_v22 }
 0x5ec   :  { %902 = vmatpush1.msra.mxu0 %v2968_v23 }
 0x5ed   :  { %1103 = vmatprep.subr.mxu0 %v2905_v4 }
 0x69d   :  { %v729_v15 = vpop.f32.mrf.mxu0 }
 0x69e   :  { %v736_v24 = vrot.slane %v729_v15, 2 }
 0x69f   :  { %v731_v25 = vpop.f32.mrf.mxu0 }
 0x6a0   :  { %v740_v27 = vadd.f32 %v736_v24, %v3053_v31  ;;  %v737_v29 = vrot.slane %v731_v25, 2 }
 0x6a2   :  { %2566 = vtanh.f32 %v740_v27  ;;  %v741_v30 = vadd.f32 %v737_v29, %v3055_v32 }
 0x6a4   :  { %2568 = vtanh.f32 %v741_v30 }
 0x6af   :  { %v2567_v33 = vpop.eup %2566 }
 0x6b0   :  { %v744_v35 = vmul.f32 %v2567_v33, %v3066_v38 }
 0x6b1   :  { %v2569_v36 = vpop.eup %2568 }
 0x6b2   :  { %v745_v40 = vmul.f32 %v2569_v36, %v3069_v39  ;;  %v746_v44 = vadd.f32 %v744_v35, %v3072_v41 }
 0x6b4   :  { %v747_v4 = vadd.f32 %v745_v40, %v3075_v42  ;;  %v751_v46 = vmul.f32 %v749_v37, %v746_v44 }
 0x6b6   :  { %v752_v47 = vmul.f32 %v747_v4, %v746_v44 }
 0x6b8   :  { %754 = vrot.lane.b32.xlu0 %v752_v47, %s2787_s1 }
 0x72a   :  { %v755_v31 = vpop.permute.xlu0 %754 }
 0x72b   :  { %v757_v49 = vadd.f32 %v755_v31, %v751_v46 }
 0x72d   :  { %2570 = vtanh.f32 %v757_v49  ;;  %v852_v61 = vrot.slane %v757_v49, 6 }
 0x73a   :  { %v2571_v32 = vpop.eup %2570 }
 0x73b   :  { %v3168_v50 = vmul.f32 %v2571_v32, %v747_v4 }
 0x73d   :  { %v767_v52 = vrot.slane %v3168_v50, 6 }
 0x73f   :  { %768 = vrot.lane.b32.xlu1 %v767_v52, %s2787_s1 }
 0x7b1   :  { %v769_v53 = vpop.permute.xlu1 %768 }
 0x7b2   :  { %2460 = vmatmul.mubr.msk.f32.vlgmr.msra.gmra.mxu1 %vm322_vm5, %v769_v53 }
 0x7b3   :  { %996 = vmatpush1.msra.mxu1 %v2911_v6  ;;  %1043 = vmatprep.mubr.f32.mxu1 %v2786_v1 }
 0x7b4   :  { %997 = vmatprep.subr.mxu1 %v2917_v8 }
 0x7b5   :  { %998 = vmatpush1.msra.mxu1 %v2922_v10 }
 0x7b6   :  { %999 = vmatprep.subr.mxu1 %v2925_v11 }
 0x7b7   :  { %1000 = vmatpush1.msra.mxu1 %v2927_v12 }
 0x7b8   :  { %1001 = vmatprep.subr.mxu1 %v2930_v13 }
 0x7b9   :  { %1002 = vmatpush1.msra.mxu1 %v2934_v14 }
 0x7ba   :  { %1003 = vmatprep.subr.mxu1 %v2941_v16 }
 0x7bb   :  { %1004 = vmatpush1.msra.mxu1 %v2944_v17 }
 0x7bc   :  { %1005 = vmatprep.subr.mxu1 %v2948_v18 }
 0x7bd   :  { %1006 = vmatpush1.msra.mxu1 %v2953_v19 }
 0x7be   :  { %1007 = vmatprep.subr.mxu1 %v2956_v20 }
 0x7bf   :  { %1008 = vmatpush1.msra.mxu1 %v2960_v21 }
 0x7c0   :  { %1009 = vmatprep.subr.mxu1 %v2964_v22 }
 0x7c1   :  { %1010 = vmatpush1.msra.mxu1 %v2968_v23 }
 0x872   :  { %v838_v54 = vpop.f32.mrf.mxu1 }
 0x873   :  { %v843_v55 = vadd.f32 %v838_v54, %v3041_v2 }
 0x874   :  { %v840_v56 = vpop.f32.mrf.mxu1 }
 0x875   :  { %2572 = vtanh.f32 %v843_v55  ;;  %v844_v57 = vadd.f32 %v840_v56, %v3046_v9 }
 0x877   :  { %2574 = vtanh.f32 %v844_v57 }
 0x882   :  { %v2573_v58 = vpop.eup %2572 }
 0x883   :  { %v847_v59 = vmul.f32 %v2573_v58, %v3066_v38 }
 0x884   :  { %v2575_v60 = vpop.eup %2574 }
 0x885   :  { %v848_v62 = vmul.f32 %v2575_v60, %v3069_v39  ;;  %v849_v63 = vadd.f32 %v847_v59, %v3072_v41 }
 0x887   :  { %v850_v0 = vadd.f32 %v848_v62, %v3075_v42  ;;  %v854_v5 = vmul.f32 %v852_v61, %v849_v63 }
 0x889   :  { %v855_v7 = vmul.f32 %v850_v0, %v849_v63 }
 0x88b   :  { %857 = vrot.lane.b32.xlu0 %v855_v7, %s2787_s1 }
 0x8fd   :  { %v858_v15 = vpop.permute.xlu0 %857 }
 0x8fe   :  { %v860_v24 = vadd.f32 %v858_v15, %v854_v5 }
 0x900   :  { %2576 = vtanh.f32 %v860_v24 }
 0x90d   :  { %v2577_v25 = vpop.eup %2576 }
 0x90e   :  { %v862_v27 = vmul.f32 %v2577_v25, %v850_v0  ;;  %v1203_v25 = vld [vmem:[#allocation7 + $0x68] sm:$0xff] }
 0x910   :  { %864 = vrot.lane.b32.xlu1 %v862_v27, %s2787_s1  ;;  %v1202_v27 = vld [vmem:[#allocation7 + $0x60] sm:$0xff] }
 0x982   :  { %v865_v29 = vpop.permute.xlu1 %864 }
 0x983   :  { %867 = vst.msk [vmem:[#allocation2 + $0x8] sm:$0x3] %vm440_vm4, %v865_v29  ;;  %868 = vst.msk [vmem:[#allocation3 + $0x6] sm:$0x3] %vm440_vm4, %v865_v29  ;;  %2461 = vmatmul.mubr.msk.f32.vlgmr.msra.gmra.mxu0 %vm322_vm5, %v865_v29 }
 0x984   :  { %1104 = vmatpush1.msra.mxu0 %v2911_v6  ;;  %1151 = vmatprep.mubr.f32.mxu0 %v2786_v1 }
 0x985   :  { %1105 = vmatprep.subr.mxu0 %v2917_v8 }
 0x986   :  { %1106 = vmatpush1.msra.mxu0 %v2922_v10 }
 0x987   :  { %1107 = vmatprep.subr.mxu0 %v2925_v11 }
 0x988   :  { %1108 = vmatpush1.msra.mxu0 %v2927_v12 }
 0x989   :  { %1109 = vmatprep.subr.mxu0 %v2930_v13 }
 0x98a   :  { %1110 = vmatpush1.msra.mxu0 %v2934_v14 }
 0x98b   :  { %1111 = vmatprep.subr.mxu0 %v2941_v16 }
 0x98c   :  { %1112 = vmatpush1.msra.mxu0 %v2944_v17 }
 0x98d   :  { %1113 = vmatprep.subr.mxu0 %v2948_v18  ;;  %v957_v18 = vrot.slane %v860_v24, 6  ;;  %v1204_v24 = vld [vmem:[#allocation7 + $0x70] sm:$0xff] }
 0x98e   :  { %1114 = vmatpush1.msra.mxu0 %v2953_v19 }
 0x98f   :  { %1115 = vmatprep.subr.mxu0 %v2956_v20 }
 0x990   :  { %1116 = vmatpush1.msra.mxu0 %v2960_v21 }
 0x991   :  { %1117 = vmatprep.subr.mxu0 %v2964_v22 }
 0x992   :  { %1118 = vmatpush1.msra.mxu0 %v2968_v23 }
 0xa43   :  { %v937_v6 = vpop.f32.mrf.mxu0 }
 0xa44   :  { %v944_v8 = vrot.slane %v937_v6, 6 }
 0xa45   :  { %v939_v10 = vpop.f32.mrf.mxu0 }
 0xa46   :  { %v948_v11 = vadd.f32 %v944_v8, %v3041_v2  ;;  %v945_v12 = vrot.slane %v939_v10, 6 }
 0xa48   :  { %2578 = vtanh.f32 %v948_v11  ;;  %v949_v13 = vadd.f32 %v945_v12, %v3046_v9 }
 0xa4a   :  { %2580 = vtanh.f32 %v949_v13  ;;  %v1201_v13 = vld [vmem:[#allocation7 + $0x58] sm:$0xff] }
 0xa55   :  { %v2579_v14 = vpop.eup %2578 }
 0xa56   :  { %v952_v16 = vmul.f32 %v2579_v14, %v3066_v38  ;;  %v1200_v14 = vld [vmem:[#allocation7 + $0x50] sm:$0xff] }
 0xa57   :  { %v2581_v17 = vpop.eup %2580 }
 0xa58   :  { %v953_v19 = vmul.f32 %v2581_v17, %v3069_v39  ;;  %v954_v20 = vadd.f32 %v952_v16, %v3072_v41  ;;  %v1199_v16 = vld [vmem:[#allocation7 + $0x48] sm:$0xff]  ;;  %v1198_v17 = vld [vmem:[#allocation7 + $0x40] sm:$0xff] }
 0xa5a   :  { %v955_v21 = vadd.f32 %v953_v19, %v3075_v42  ;;  %v959_v22 = vmul.f32 %v957_v18, %v954_v20  ;;  %v1197_v19 = vld [vmem:[#allocation7 + $0x38] sm:$0xff] }
 0xa5c   :  { %v960_v23 = vmul.f32 %v955_v21, %v954_v20  ;;  %v1196_v20 = vld [vmem:[#allocation7 + $0x30] sm:$0xff] }
 0xa5e   :  { %962 = vrot.lane.b32.xlu0 %v960_v23, %s2787_s1 }
 0xad0   :  { %v963_v30 = vpop.permute.xlu0 %962 }
 0xad1   :  { %v965_v33 = vadd.f32 %v963_v30, %v959_v22 }
 0xad3   :  { %2582 = vtanh.f32 %v965_v33  ;;  %v1065_v54 = vrot.slane %v965_v33, 6 }
 0xae0   :  { %v2583_v35 = vpop.eup %2582 }
 0xae1   :  { %v3223_v36 = vmul.f32 %v2583_v35, %v955_v21  ;;  %v1195_v21 = vld [vmem:[#allocation7 + $0x28] sm:$0xff]  ;;  %v1193_v35 = vld [vmem:[#allocation7 + $0x18] sm:$0xff] }
 0xae3   :  { %v974_v37 = vrot.slane %v3223_v36, 2 }
 0xae5   :  { %975 = vrot.lane.b32.xlu1 %v974_v37, %s2787_s1  ;;  %v1192_v37 = vld [vmem:[#allocation7 + $0x10] sm:$0xff] }
 0xb57   :  { %v976_v40 = vpop.permute.xlu1 %975 }
 0xb58   :  { %2462 = vmatmul.mubr.msk.f32.vlgmr.msra.gmra.mxu1 %vm322_vm5, %v976_v40  ;;  %v1191_v40 = vld [vmem:[#allocation7 + $0x8] sm:$0xff] }
 0xb59   :  { %1313 = vmatprep.mubr.f32.mxu1 %v2786_v1 }
 0xc18   :  { %v1045_v44 = vpop.f32.mrf.mxu1 }
 0xc19   :  { %v1052_v4 = vrot.slane %v1045_v44, 4 }
 0xc1a   :  { %v1047_v46 = vpop.f32.mrf.mxu1 }
 0xc1b   :  { %v1056_v47 = vadd.f32 %v1052_v4, %v3041_v2  ;;  %v1053_v31 = vrot.slane %v1047_v46, 4  ;;  %v1190_v46 = vld [vmem:[#allocation7] sm:$0xff] }
 0xc1d   :  { %2584 = vtanh.f32 %v1056_v47  ;;  %v1057_v49 = vadd.f32 %v1053_v31, %v3046_v9  ;;  %v1221_v31 = vld [vmem:[#allocation9 + $0x78] sm:$0xff] }
 0xc1e   :  { %1265 = vmatprep.subr.mxu1 %v1221_v31 }
 0xc1f   :  { %2586 = vtanh.f32 %v1057_v49  ;;  %v1220_v49 = vld [vmem:[#allocation9 + $0x70] sm:$0xff] }
 0xc20   :  { %1266 = vmatpush1.msra.mxu1 %v1220_v49 }
 0xc2a   :  { %v2585_v32 = vpop.eup %2584 }
 0xc2b   :  { %v1060_v52 = vmul.f32 %v2585_v32, %v3066_v38  ;;  %v1219_v32 = vld [vmem:[#allocation9 + $0x68] sm:$0xff] }
 0xc2c   :  { %v2587_v53 = vpop.eup %2586  ;;  %1267 = vmatprep.subr.mxu1 %v1219_v32 }
 0xc2d   :  { %v1061_v55 = vmul.f32 %v2587_v53, %v3069_v39  ;;  %v1062_v56 = vadd.f32 %v1060_v52, %v3072_v41  ;;  %v1218_v52 = vld [vmem:[#allocation9 + $0x60] sm:$0xff]  ;;  %v1217_v53 = vld [vmem:[#allocation9 + $0x58] sm:$0xff] }
 0xc2e   :  { %1268 = vmatpush1.msra.mxu1 %v1218_v52 }
 0xc2f   :  { %v1063_v57 = vadd.f32 %v1061_v55, %v3075_v42  ;;  %v1067_v58 = vmul.f32 %v1065_v54, %v1062_v56  ;;  %v1216_v54 = vld [vmem:[#allocation9 + $0x50] sm:$0xff]  ;;  %v1215_v55 = vld [vmem:[#allocation9 + $0x48] sm:$0xff]  ;;  %1269 = vmatprep.subr.mxu1 %v1217_v53 }
 0xc30   :  { %1270 = vmatpush1.msra.mxu1 %v1216_v54 }
 0xc31   :  { %v1068_v59 = vmul.f32 %v1063_v57, %v1062_v56  ;;  %v1214_v56 = vld [vmem:[#allocation9 + $0x40] sm:$0xff]  ;;  %1271 = vmatprep.subr.mxu1 %v1215_v55 }
 0xc32   :  { %1272 = vmatpush1.msra.mxu1 %v1214_v56 }
 0xc33   :  { %1070 = vrot.lane.b32.xlu0 %v1068_v59, %s2787_s1 }
 0xca5   :  { %v1071_v60 = vpop.permute.xlu0 %1070 }
 0xca6   :  { %v3236_v61 = vadd.f32 %v1071_v60, %v1067_v58  ;;  %v1211_v60 = vld [vmem:[#allocation9 + $0x28] sm:$0xff] }
 0xca8   :  { %2588 = vtanh.f32 %v3236_v61 }
 0xcb5   :  { %v2589_v62 = vpop.eup %2588 }
 0xcb6   :  { %v1075_v63 = vmul.f32 %v2589_v62, %v1063_v57  ;;  %v1213_v57 = vld [vmem:[#allocation9 + $0x38] sm:$0xff] }
 0xcb7   :  { %1273 = vmatprep.subr.mxu1 %v1213_v57  ;;  %v1209_v62 = vld [vmem:[#allocation9 + $0x18] sm:$0xff] }
 0xcb8   :  { %v1082_v0 = vrot.slane %v1075_v63, 4 }
 0xcba   :  { %1083 = vrot.lane.b32.xlu1 %v1082_v0, %s2787_s1  ;;  %v1208_v0 = vld [vmem:[#allocation9 + $0x10] sm:$0xff] }
 0xcbe   :  { %543 = vrot.lane.b32.xlu1 %v3110_v34, %s2787_s1 }
 0xcc2   :  { %761 = vrot.lane.b32.xlu1 %v3168_v50, %s2787_s1  ;;  %v1205_v50 = vld [vmem:[#allocation7 + $0x78] sm:$0xff] }
 0xcc3   :  { %1348 = vmatprep.subr.mxu0 %v1205_v50  ;;  %v3278_v50 = vld [vmem:[#allocation10 + $0x70] sm:$0xff] }
 0xcc6   :  { %1077 = vrot.lane.b32.xlu1 %v1075_v63, %s2787_s1 }
 0xd2c   :  { %v1084_v5 = vpop.permute.xlu1 %1083 }
 0xd2d   :  { %2463 = vmatmul.mubr.msk.f32.vlgmr.msra.gmra.mxu0 %vm322_vm5, %v1084_v5  ;;  %v3270_v5 = vld [vmem:[#allocation10 + $0x78] sm:$0xff] }
 0xd2e   :  { %1396 = vmatprep.mubr.f32.mxu0 %v2786_v1  ;;  %1349 = vmatpush1.msra.mxu0 %v1204_v24  ;;  %v3280_v24 = vld [vmem:[#allocation10 + $0x68] sm:$0xff] }
 0xd2f   :  { %1350 = vmatprep.subr.mxu0 %v1203_v25 }
 0xd30   :  { %v544_v7 = vpop.permute.xlu1 %543  ;;  %1351 = vmatpush1.msra.mxu0 %v1202_v27  ;;  %v3283_v27 = vld [vmem:[#allocation10 + $0x60] sm:$0xff] }
 0xd31   :  { %547 = vst.msk [vmem:[#allocation2] sm:$0xc] %vm546_vm6, %v544_v7  ;;  %548 = vst.msk [vmem:[#allocation3 + $0xa] sm:$0xc] %vm546_vm6, %v544_v7  ;;  %1352 = vmatprep.subr.mxu0 %v1201_v13  ;;  %v1207_v7 = vld [vmem:[#allocation9 + $0x8] sm:$0xff]  ;;  %v3303_v13 = vld [vmem:[#allocation10 + $0x30] sm:$0xff] }
 0xd32   :  { %1353 = vmatpush1.msra.mxu0 %v1200_v14  ;;  %v3306_v14 = vld [vmem:[#allocation10 + $0x28] sm:$0xff] }
 0xd33   :  { %1354 = vmatprep.subr.mxu0 %v1199_v16  ;;  %v3309_v16 = vld [vmem:[#allocation10 + $0x20] sm:$0xff] }
 0xd34   :  { %v762_v15 = vpop.permute.xlu1 %761  ;;  %1355 = vmatpush1.msra.mxu0 %v1198_v17  ;;  %v3312_v17 = vld [vmem:[#allocation10 + $0x18] sm:$0xff] }
 0xd35   :  { %765 = vst.msk [vmem:[#allocation2] sm:$0xc0] %vm764_vm7, %v762_v15  ;;  %766 = vst.msk [vmem:[#allocation3 + $0x2] sm:$0xc0] %vm764_vm7, %v762_v15  ;;  %1356 = vmatprep.subr.mxu0 %v1197_v19  ;;  %v1206_v15 = vld [vmem:[#allocation9] sm:$0xff]  ;;  %v3318_v19 = vld [vmem:[#allocation10 + $0x8] sm:$0xff] }
 0xd36   :  { %1357 = vmatpush1.msra.mxu0 %v1196_v20  ;;  %v3321_v20 = vld [vmem:[#allocation10] sm:$0xff] }
 0xd37   :  { %1358 = vmatprep.subr.mxu0 %v1195_v21 }
 0xd38   :  { %v1078_v34 = vpop.permute.xlu1 %1077 }
 0xd39   :  { %1080 = vst.msk [vmem:[#allocation2 + $0x8] sm:$0x30] %vm655_vm8, %v1078_v34  ;;  %1081 = vst.msk [vmem:[#allocation3 - $0x2] sm:$0x30] %vm655_vm8, %v1078_v34 }
 0xded   :  { %v1153_v29 = vpop.f32.mrf.mxu0 }
 0xdee   :  { %v1160_v6 = vrot.slane %v1153_v29, 2 }
 0xdef   :  { %v1155_v8 = vpop.f32.mrf.mxu0 }
 0xdf0   :  { %v1164_v10 = vadd.f32 %v1160_v6, %v3041_v2  ;;  %v1161_v11 = vrot.slane %v1155_v8, 2  ;;  %v1194_v2 = vld [vmem:[#allocation7 + $0x20] sm:$0xff]  ;;  %v3287_v6 = vld [vmem:[#allocation10 + $0x58] sm:$0xff]  ;;  %v3290_v8 = vld [vmem:[#allocation10 + $0x50] sm:$0xff] }
 0xdf1   :  { %1359 = vmatpush1.msra.mxu0 %v1194_v2 }
 0xdf2   :  { %2590 = vtanh.f32 %v1164_v10  ;;  %v1165_v12 = vadd.f32 %v1161_v11, %v3046_v9  ;;  %v1173_v9 = vrot.slane %v3236_v61, 6  ;;  %1360 = vmatprep.subr.mxu0 %v1193_v35  ;;  %v1210_v61 = vld [vmem:[#allocation9 + $0x20] sm:$0xff]  ;;  %v3294_v10 = vld [vmem:[#allocation10 + $0x48] sm:$0xff] }
 0xdf3   :  { %1361 = vmatpush1.msra.mxu0 %v1192_v37  ;;  %v3297_v11 = vld [vmem:[#allocation10 + $0x40] sm:$0xff] }
 0xdf4   :  { %2592 = vtanh.f32 %v1165_v12  ;;  %1362 = vmatprep.subr.mxu0 %v1191_v40  ;;  %v3300_v12 = vld [vmem:[#allocation10 + $0x38] sm:$0xff] }
 0xdf5   :  { %1363 = vmatpush1.msra.mxu0 %v1190_v46 }
 0xdf6   :  { %1577 = vmatprep.subr.mxu0 %v3270_v5 }
 0xdff   :  { %v2591_v18 = vpop.eup %2590 }
 0xe00   :  { %v1168_v22 = vmul.f32 %v2591_v18, %v3066_v38  ;;  %v3315_v18 = vld [vmem:[#allocation10 + $0x10] sm:$0xff] }
 0xe01   :  { %v2593_v23 = vpop.eup %2592 }
 0xe02   :  { %v1169_v30 = vmul.f32 %v2593_v23, %v3069_v39  ;;  %v1170_v33 = vadd.f32 %v1168_v22, %v3072_v41 }
 0xe04   :  { %v3260_v44 = vadd.f32 %v1169_v30, %v3075_v42  ;;  %v1175_v4 = vmul.f32 %v1173_v9, %v1170_v33  ;;  %v1238_v9 = vld [vmem:[%s3597_s10] sm:$0x3] }
 0xe06   :  { %v1176_v47 = vmul.f32 %v3260_v44, %v1170_v33  ;;  %v1413_v33 = vrot.slane %v1238_v9, %v3005_v26 }
 0xe08   :  { %1178 = vrot.lane.b32.xlu0 %v1176_v47, %s2787_s1 }
 0xe0c   :  { %652 = vrot.lane.b32.xlu0 %v3139_v3, %s2787_s1 }
 0xe10   :  { %969 = vrot.lane.b32.xlu0 %v3223_v36, %s2787_s1  ;;  %v1212_v36 = vld [vmem:[#allocation9 + $0x30] sm:$0xff] }
 0xe11   :  { %1274 = vmatpush1.msra.mxu1 %v1212_v36 }
 0xe12   :  { %1275 = vmatprep.subr.mxu1 %v1211_v60 }
 0xe13   :  { %1276 = vmatpush1.msra.mxu1 %v1210_v61 }
 0xe14   :  { %1277 = vmatprep.subr.mxu1 %v1209_v62 }
 0xe15   :  { %1278 = vmatpush1.msra.mxu1 %v1208_v0 }
 0xe16   :  { %1279 = vmatprep.subr.mxu1 %v1207_v7 }
 0xe17   :  { %1280 = vmatpush1.msra.mxu1 %v1206_v15 }
 0xe18   :  { %1484 = vmatprep.subr.mxu1 %v3270_v5 }
 0xe7a   :  { %v1179_v3 = vpop.permute.xlu0 %1178 }
 0xe7b   :  { %v1181_v58 = vadd.f32 %v1179_v3, %v1175_v4 }
 0xe7d   :  { %2594 = vtanh.f32 %v1181_v58 }
 0xe7e   :  { %v653_v59 = vpop.permute.xlu0 %652 }
 0xe7f   :  { %656 = vst.msk [vmem:[#allocation2] sm:$0x30] %vm655_vm8, %v653_v59  ;;  %657 = vst.msk [vmem:[#allocation3 + $0x6] sm:$0x30] %vm655_vm8, %v653_v59 }
 0xe82   :  { %v970_v63 = vpop.permute.xlu0 %969 }
 0xe83   :  { %972 = vst.msk [vmem:[#allocation2 + $0x8] sm:$0xc] %vm546_vm6, %v970_v63  ;;  %973 = vst.msk [vmem:[#allocation3 + $0x2] sm:$0xc] %vm546_vm6, %v970_v63 }
 0xe86   :  { %v1239_v34 = vld [vmem:[#allocation2] sm:$0xff]  ;;  %v1242_v23 = vld [vmem:[#allocation3 + $0x8] sm:$0xff] }
 0xe87   :  { %2466 = vmatmul.mubr.msk.f32.vlgmr.msra.gmra.mxu0 %vm322_vm5, %v1239_v34 }
 0xe88   :  { %1402 = vmatprep.mubr.f32.mxu0 %v2786_v1  ;;  %1578 = vmatpush1.msra.mxu0 %v3278_v50 }
 0xe89   :  { %1579 = vmatprep.subr.mxu0 %v3280_v24 }
 0xe8a   :  { %v2595_v25 = vpop.eup %2594  ;;  %1580 = vmatpush1.msra.mxu0 %v3283_v27 }
 0xe8b   :  { %v1183_v29 = vmul.f32 %v2595_v25, %v3260_v44  ;;  %1581 = vmatprep.subr.mxu0 %v3287_v6  ;;  %v1417_v44 = vrot.slane %v1238_v9, %v3010_v28 }
 0xe8c   :  { %1582 = vmatpush1.msra.mxu0 %v3290_v8 }
 0xe8d   :  { %1185 = vrot.lane.b32.xlu0 %v1183_v29, %s2787_s1  ;;  %1583 = vmatprep.subr.mxu0 %v3294_v10 }
 0xe8e   :  { %1584 = vmatpush1.msra.mxu0 %v3297_v11 }
 0xe8f   :  { %1585 = vmatprep.subr.mxu0 %v3300_v12 }
 0xe90   :  { %1586 = vmatpush1.msra.mxu0 %v3303_v13 }
 0xe91   :  { %1587 = vmatprep.subr.mxu0 %v3306_v14 }
 0xe92   :  { %1588 = vmatpush1.msra.mxu0 %v3309_v16 }
 0xe93   :  { %1589 = vmatprep.subr.mxu0 %v3312_v17 }
 0xe94   :  { %1590 = vmatpush1.msra.mxu0 %v3315_v18 }
 0xe95   :  { %1591 = vmatprep.subr.mxu0 %v3318_v19 }
 0xe96   :  { %1592 = vmatpush1.msra.mxu0 %v3321_v20 }
 0xe97   :  { %1783 = vmatprep.subr.mxu0 %v3270_v5 }
 0xeff   :  { %v1186_v21 = vpop.permute.xlu0 %1185 }
 0xf00   :  { %1188 = vst.msk [vmem:[#allocation2 + $0x8] sm:$0xc0] %vm764_vm7, %v1186_v21  ;;  %1189 = vst.msk [vmem:[#allocation3 - $0x6] sm:$0xc0] %vm764_vm7, %v1186_v21 }
 0xf07   :  { %v1241_v22 = vld [vmem:[#allocation3] sm:$0xff]  ;;  %v1240_v2 = vld [vmem:[#allocation2 + $0x8] sm:$0xff] }
 0xf08   :  { %2464 = vmatmul.mubr.msk.f32.vlgmr.msra.gmra.mxu1 %vm322_vm5, %v1241_v22  ;;  %2467 = vmatmul.mubr.msk.f32.gmra.mxu0 %vm322_vm5, %v1240_v2 }
 0xf09   :  { %1485 = vmatpush1.msra.mxu1 %v3278_v50  ;;  %1319 = vmatprep.mubr.f32.mxu1 %v2786_v1 }
 0xf0a   :  { %1486 = vmatprep.subr.mxu1 %v3280_v24  ;;  %1625 = vmatprep.mubr.f32.mxu0 %v2786_v1 }
 0xf0b   :  { %1487 = vmatpush1.msra.mxu1 %v3283_v27 }
 0xf0c   :  { %1488 = vmatprep.subr.mxu1 %v3287_v6  ;;  %2465 = vmatmul.mubr.msk.f32.gmra.mxu1 %vm322_vm5, %v1242_v23 }
 0xf0d   :  { %1489 = vmatpush1.msra.mxu1 %v3290_v8  ;;  %1532 = vmatprep.mubr.f32.mxu1 %v2786_v1 }
 0xf0e   :  { %1490 = vmatprep.subr.mxu1 %v3294_v10 }
 0xf0f   :  { %1491 = vmatpush1.msra.mxu1 %v3297_v11 }
 0xf10   :  { %1492 = vmatprep.subr.mxu1 %v3300_v12 }
 0xf11   :  { %1493 = vmatpush1.msra.mxu1 %v3303_v13 }
 0xf12   :  { %1494 = vmatprep.subr.mxu1 %v3306_v14 }
 0xf13   :  { %1495 = vmatpush1.msra.mxu1 %v3309_v16 }
 0xf14   :  { %1496 = vmatprep.subr.mxu1 %v3312_v17 }
 0xf15   :  { %1497 = vmatpush1.msra.mxu1 %v3315_v18 }
 0xf16   :  { %1498 = vmatprep.subr.mxu1 %v3318_v19 }
 0xf17   :  { %1499 = vmatpush1.msra.mxu1 %v3321_v20 }
 0xf18   :  { %1533 = vmatmul.mubr.f32.vlgmr.msra.gmra.mxu1 %v2786_v1  ;;  %1680 = vmatprep.subr.mxu1 %v3270_v5 }
 0xf19   :  { %1681 = vmatpush1.msra.mxu1 %v3278_v50  ;;  %1728 = vmatprep.mubr.f32.mxu1 %v2786_v1 }
 0xf1a   :  { %1682 = vmatprep.subr.mxu1 %v3280_v24 }
 0xf1b   :  { %1683 = vmatpush1.msra.mxu1 %v3283_v27 }
 0xf1c   :  { %1684 = vmatprep.subr.mxu1 %v3287_v6 }
 0xf1d   :  { %1685 = vmatpush1.msra.mxu1 %v3290_v8 }
 0xf1e   :  { %1686 = vmatprep.subr.mxu1 %v3294_v10 }
 0xf1f   :  { %1687 = vmatpush1.msra.mxu1 %v3297_v11 }
 0xf20   :  { %1688 = vmatprep.subr.mxu1 %v3300_v12 }
 0xf21   :  { %1689 = vmatpush1.msra.mxu1 %v3303_v13 }
 0xf22   :  { %1690 = vmatprep.subr.mxu1 %v3306_v14 }
 0xf23   :  { %1691 = vmatpush1.msra.mxu1 %v3309_v16 }
 0xf24   :  { %1692 = vmatprep.subr.mxu1 %v3312_v17 }
 0xf25   :  { %1693 = vmatpush1.msra.mxu1 %v3315_v18 }
 0xf26   :  { %1694 = vmatprep.subr.mxu1 %v3318_v19 }
 0xf27   :  { %1695 = vmatpush1.msra.mxu1 %v3321_v20 }
 0xf28   :  { %1886 = vmatprep.subr.mxu1 %v3270_v5 }
 0xf47   :  { %v1398_v30 = vpop.f32.mrf.mxu0 }
 0xf49   :  { %v1400_v37 = vpop.f32.mrf.mxu0 }
 0xfc8   :  { %v1315_v35 = vpop.f32.mrf.mxu1  ;;  %v1404_v47 = vpop.f32.mrf.mxu0 }
 0xfc9   :  { %v1399_v40 = vadd.f32 %v1398_v30, %v1315_v35 }
 0xfca   :  { %v1317_v4 = vpop.f32.mrf.mxu1  ;;  %v1406_v26 = vpop.f32.mrf.mxu0 }
 0xfcb   :  { %v1420_v46 = vadd.f32 %v1413_v33, %v1399_v40  ;;  %v1401_v31 = vadd.f32 %v1400_v37, %v1317_v4 }
 0xfcc   :  { %v1321_v49 = vpop.f32.mrf.mxu1 }
 0xfcd   :  { %v1436_v32 = vrot.slane %v1420_v46, 6  ;;  %v1440_v52 = vrot.slane %v1420_v46, 2  ;;  %v1421_v53 = vadd.f32 %v1417_v44, %v1401_v31  ;;  %v1405_v54 = vadd.f32 %v1404_v47, %v1321_v49 }
 0xfce   :  { %v1323_v55 = vpop.f32.mrf.mxu1 }
 0xfcf   :  { %v1450_v56 = vsel %vm273_vm1, %v1436_v32, %v1440_v52  ;;  %v1437_v57 = vrot.slane %v1421_v53, 6  ;;  %v1441_v3 = vrot.slane %v1421_v53, 2  ;;  %v1422_v59 = vadd.f32 %v1413_v33, %v1405_v54 }
 0xfd0   :  { %v1452_v58 = vsel %vm276_vm2, %v1450_v56, %v1436_v32  ;;  %v1407_v36 = vadd.f32 %v1406_v26, %v1323_v55  ;;  %v1456_v33 = vmul.f32 %v1420_v46, %v3023_v45  ;;  %v1457_v49 = vmul.f32 %v1421_v53, %v3031_v51 }
 0xfd1   :  { %v1451_v28 = vsel %vm273_vm1, %v1437_v57, %v1441_v3  ;;  %v1454_v60 = vsel %vm279_vm3, %v1452_v58, %v1440_v52  ;;  %v1426_v62 = vrot.slane %v1422_v59, 6  ;;  %v1430_v63 = vrot.slane %v1422_v59, 2 }
 0xfd2   :  { %v1453_v61 = vsel %vm276_vm2, %v1451_v28, %v1437_v57  ;;  %v1458_v0 = vmul.f32 %v1422_v59, %v3023_v45  ;;  %v1423_v7 = vadd.f32 %v1417_v44, %v1407_v36  ;;  %v1462_v15 = vmul.f32 %v1454_v60, %v3019_v43 }
 0xfd3   :  { %v1455_v34 = vsel %vm279_vm3, %v1453_v61, %v1441_v3  ;;  %v1444_v25 = vsel %vm273_vm1, %v1426_v62, %v1430_v63 }
 0xfd4   :  { %v1463_v29 = vmul.f32 %v1455_v34, %v3026_v48  ;;  %v1446_v21 = vsel %vm276_vm2, %v1444_v25, %v1426_v62  ;;  %v1427_v22 = vrot.slane %v1423_v7, 6  ;;  %v1431_v2 = vrot.slane %v1423_v7, 2 }
 0xfd5   :  { %v1459_v23 = vmul.f32 %v1423_v7, %v3031_v51  ;;  %v1448_v9 = vsel %vm279_vm3, %v1446_v21, %v1430_v63  ;;  %v3386_v30 = vadd.f32 %v1462_v15, %v1458_v0 }
 0xfd6   :  { %v1445_v35 = vsel %vm273_vm1, %v1427_v22, %v1431_v2  ;;  %v1460_v37 = vmul.f32 %v1448_v9, %v3019_v43 }
 0xfd7   :  { %v3391_v40 = vadd.f32 %v1463_v29, %v1459_v23  ;;  %v1447_v44 = vsel %vm276_vm2, %v1445_v35, %v1427_v22 }
 0xfd8   :  { %v3394_v4 = vadd.f32 %v1460_v37, %v1456_v33  ;;  %v1534_v47 = vpop.f32.mrf.mxu1  ;;  %v1449_v31 = vsel %vm279_vm3, %v1447_v44, %v1431_v2 }
 0xfd9   :  { %v1461_v32 = vmul.f32 %v1449_v31, %v3026_v48 }
 0xfda   :  { %v1539_v52 = vadd.f32 %v1534_v47, %v3394_v4  ;;  %v1536_v46 = vpop.f32.mrf.mxu1 }
 0xfdb   :  { %v3400_v45 = vadd.f32 %v1461_v32, %v1457_v49 }
 0xfdc   :  { %2596 = vtanh.f32 %v1539_v52 }
 0xfdd   :  { %v1540_v43 = vadd.f32 %v1536_v46, %v3400_v45 }
 0xfdf   :  { %2598 = vtanh.f32 %v1540_v43 }
 0xfe9   :  { %v2597_v54 = vpop.eup %2596 }
 0xfea   :  { %v1543_v55 = vmul.f32 %v2597_v54, %v3066_v38 }
 0xfec   :  { %v2599_v56 = vpop.eup %2598  ;;  %v1545_v3 = vadd.f32 %v1543_v55, %v3072_v41 }
 0xfed   :  { %v1544_v57 = vmul.f32 %v2599_v56, %v3069_v39 }
 0xfee   :  { %v1547_v53 = vmul.f32 0.0, %v1545_v3 }
 0xfef   :  { %v1546_v51 = vadd.f32 %v1544_v57, %v3075_v42 }
 0xff1   :  { %v1548_v48 = vmul.f32 %v1546_v51, %v1545_v3 }
 0xff3   :  { %1550 = vrot.lane.b32.xlu1 %v1548_v48, %s2787_s1 }
0x1065   :  { %v1551_v26 = vpop.permute.xlu1 %1550 }
0x1066   :  { %v1553_v58 = vadd.f32 %v1551_v26, %v1547_v53 }
0x1068   :  { %2600 = vtanh.f32 %v1553_v58  ;;  %v1647_v29 = vrot.slane %v1553_v58, 6 }
0x1075   :  { %v2601_v59 = vpop.eup %2600 }
0x1076   :  { %v1555_v36 = vmul.f32 %v2601_v59, %v1546_v51 }
0x1078   :  { %1557 = vrot.lane.b32.xlu0 %v1555_v36, %s2787_s1 }
0x10ea   :  { %v3409_v28 = vpop.permute.xlu0 %1557 }
0x10eb   :  { %2468 = vmatmul.mubr.msk.f32.vlgmr.msra.gmra.mxu0 %vm322_vm5, %v3409_v28 }
0x10ec   :  { %1784 = vmatpush1.msra.mxu0 %v3278_v50  ;;  %1831 = vmatprep.mubr.f32.mxu0 %v2786_v1 }
0x10ed   :  { %1785 = vmatprep.subr.mxu0 %v3280_v24 }
0x10ee   :  { %1786 = vmatpush1.msra.mxu0 %v3283_v27 }
0x10ef   :  { %1787 = vmatprep.subr.mxu0 %v3287_v6 }
0x10f0   :  { %1788 = vmatpush1.msra.mxu0 %v3290_v8 }
0x10f1   :  { %1789 = vmatprep.subr.mxu0 %v3294_v10 }
0x10f2   :  { %1790 = vmatpush1.msra.mxu0 %v3297_v11 }
0x10f3   :  { %1791 = vmatprep.subr.mxu0 %v3300_v12 }
0x10f4   :  { %1792 = vmatpush1.msra.mxu0 %v3303_v13 }
0x10f5   :  { %1793 = vmatprep.subr.mxu0 %v3306_v14 }
0x10f6   :  { %1794 = vmatpush1.msra.mxu0 %v3309_v16 }
0x10f7   :  { %1795 = vmatprep.subr.mxu0 %v3312_v17 }
0x10f8   :  { %1796 = vmatpush1.msra.mxu0 %v3315_v18 }
0x10f9   :  { %1797 = vmatprep.subr.mxu0 %v3318_v19 }
0x10fa   :  { %1798 = vmatpush1.msra.mxu0 %v3321_v20 }
0x10fb   :  { %1982 = vmatprep.subr.mxu0 %v3270_v5 }
0x11ab   :  { %v1627_v60 = vpop.f32.mrf.mxu0 }
0x11ac   :  { %v1634_v61 = vrot.slane %v1627_v60, 6 }
0x11ad   :  { %v1629_v62 = vpop.f32.mrf.mxu0 }
0x11ae   :  { %v1638_v63 = vadd.f32 %v1634_v61, %v3394_v4  ;;  %v1635_v0 = vrot.slane %v1629_v62, 6 }
0x11b0   :  { %2602 = vtanh.f32 %v1638_v63  ;;  %v1639_v7 = vadd.f32 %v1635_v0, %v3400_v45 }
0x11b2   :  { %2604 = vtanh.f32 %v1639_v7 }
0x11bd   :  { %v2603_v15 = vpop.eup %2602 }
0x11be   :  { %v1642_v34 = vmul.f32 %v2603_v15, %v3066_v38 }
0x11bf   :  { %v2605_v25 = vpop.eup %2604 }
0x11c0   :  { %v1643_v21 = vmul.f32 %v2605_v25, %v3069_v39  ;;  %v1644_v22 = vadd.f32 %v1642_v34, %v3072_v41 }
0x11c2   :  { %v1645_v2 = vadd.f32 %v1643_v21, %v3075_v42  ;;  %v1649_v23 = vmul.f32 %v1647_v29, %v1644_v22 }
0x11c4   :  { %v1650_v9 = vmul.f32 %v1645_v2, %v1644_v22 }
0x11c6   :  { %1652 = vrot.lane.b32.xlu1 %v1650_v9, %s2787_s1 }
0x1238   :  { %v1653_v33 = vpop.permute.xlu1 %1652 }
0x1239   :  { %v1655_v35 = vadd.f32 %v1653_v33, %v1649_v23 }
0x123b   :  { %2606 = vtanh.f32 %v1655_v35  ;;  %v1750_v3 = vrot.slane %v1655_v35, 6 }
0x1248   :  { %v2607_v37 = vpop.eup %2606 }
0x1249   :  { %v1657_v44 = vmul.f32 %v2607_v37, %v1645_v2 }
0x124b   :  { %v1659_v47 = vrot.slane %v1657_v44, 2 }
0x124d   :  { %1660 = vrot.lane.b32.xlu0 %v1659_v47, %s2787_s1 }
0x12bf   :  { %v1661_v31 = vpop.permute.xlu0 %1660 }
0x12c0   :  { %2469 = vmatmul.mubr.msk.f32.vlgmr.msra.gmra.mxu1 %vm322_vm5, %v1661_v31 }
0x12c1   :  { %1887 = vmatpush1.msra.mxu1 %v3278_v50  ;;  %1934 = vmatprep.mubr.f32.mxu1 %v2786_v1 }
0x12c2   :  { %1888 = vmatprep.subr.mxu1 %v3280_v24 }
0x12c3   :  { %1889 = vmatpush1.msra.mxu1 %v3283_v27 }
0x12c4   :  { %1890 = vmatprep.subr.mxu1 %v3287_v6 }
0x12c5   :  { %1891 = vmatpush1.msra.mxu1 %v3290_v8 }
0x12c6   :  { %1892 = vmatprep.subr.mxu1 %v3294_v10 }
0x12c7   :  { %1893 = vmatpush1.msra.mxu1 %v3297_v11 }
0x12c8   :  { %1894 = vmatprep.subr.mxu1 %v3300_v12 }
0x12c9   :  { %1895 = vmatpush1.msra.mxu1 %v3303_v13 }
0x12ca   :  { %1896 = vmatprep.subr.mxu1 %v3306_v14 }
0x12cb   :  { %1897 = vmatpush1.msra.mxu1 %v3309_v16 }
0x12cc   :  { %1898 = vmatprep.subr.mxu1 %v3312_v17 }
0x12cd   :  { %1899 = vmatpush1.msra.mxu1 %v3315_v18 }
0x12ce   :  { %1900 = vmatprep.subr.mxu1 %v3318_v19 }
0x12cf   :  { %1901 = vmatpush1.msra.mxu1 %v3321_v20 }
0x12d0   :  { %2085 = vmatprep.subr.mxu1 %v3270_v5 }
0x1380   :  { %v1730_v49 = vpop.f32.mrf.mxu1 }
0x1381   :  { %v1737_v32 = vrot.slane %v1730_v49, 4 }
0x1382   :  { %v1732_v52 = vpop.f32.mrf.mxu1 }
0x1383   :  { %v1741_v46 = vadd.f32 %v1737_v32, %v3394_v4  ;;  %v1738_v43 = vrot.slane %v1732_v52, 4 }
0x1385   :  { %2608 = vtanh.f32 %v1741_v46  ;;  %v1742_v54 = vadd.f32 %v1738_v43, %v3400_v45 }
0x1387   :  { %2610 = vtanh.f32 %v1742_v54 }
0x1392   :  { %v2609_v55 = vpop.eup %2608 }
0x1393   :  { %v1745_v56 = vmul.f32 %v2609_v55, %v3066_v38 }
0x1394   :  { %v2611_v57 = vpop.eup %2610 }
0x1395   :  { %v1746_v51 = vmul.f32 %v2611_v57, %v3069_v39  ;;  %v1747_v48 = vadd.f32 %v1745_v56, %v3072_v41 }
0x1397   :  { %v1748_v53 = vadd.f32 %v1746_v51, %v3075_v42  ;;  %v1752_v26 = vmul.f32 %v1750_v3, %v1747_v48 }
0x1399   :  { %v1753_v58 = vmul.f32 %v1748_v53, %v1747_v48 }
0x139b   :  { %1755 = vrot.lane.b32.xlu1 %v1753_v58, %s2787_s1 }
0x140d   :  { %v1756_v59 = vpop.permute.xlu1 %1755 }
0x140e   :  { %v1758_v36 = vadd.f32 %v1756_v59, %v1752_v26 }
0x1410   :  { %2612 = vtanh.f32 %v1758_v36  ;;  %v1853_v23 = vrot.slane %v1758_v36, 6 }
0x141d   :  { %v2613_v60 = vpop.eup %2612 }
0x141e   :  { %v1760_v61 = vmul.f32 %v2613_v60, %v1748_v53 }
0x1420   :  { %v1762_v62 = vrot.slane %v1760_v61, 4 }
0x1422   :  { %1763 = vrot.lane.b32.xlu0 %v1762_v62, %s2787_s1 }
0x1494   :  { %v1764_v63 = vpop.permute.xlu0 %1763 }
0x1495   :  { %2470 = vmatmul.mubr.msk.f32.vlgmr.msra.gmra.mxu0 %vm322_vm5, %v1764_v63 }
0x1496   :  { %1983 = vmatpush1.msra.mxu0 %v3278_v50  ;;  %2030 = vmatprep.mubr.f32.mxu0 %v2786_v1 }
0x1497   :  { %1984 = vmatprep.subr.mxu0 %v3280_v24 }
0x1498   :  { %1985 = vmatpush1.msra.mxu0 %v3283_v27 }
0x1499   :  { %1986 = vmatprep.subr.mxu0 %v3287_v6 }
0x149a   :  { %1987 = vmatpush1.msra.mxu0 %v3290_v8 }
0x149b   :  { %1988 = vmatprep.subr.mxu0 %v3294_v10 }
0x149c   :  { %1989 = vmatpush1.msra.mxu0 %v3297_v11 }
0x149d   :  { %1990 = vmatprep.subr.mxu0 %v3300_v12 }
0x149e   :  { %1991 = vmatpush1.msra.mxu0 %v3303_v13 }
0x149f   :  { %1992 = vmatprep.subr.mxu0 %v3306_v14 }
0x14a0   :  { %1993 = vmatpush1.msra.mxu0 %v3309_v16 }
0x14a1   :  { %1994 = vmatprep.subr.mxu0 %v3312_v17 }
0x14a2   :  { %1995 = vmatpush1.msra.mxu0 %v3315_v18 }
0x14a3   :  { %1996 = vmatprep.subr.mxu0 %v3318_v19 }
0x14a4   :  { %1997 = vmatpush1.msra.mxu0 %v3321_v20 }
0x14a5   :  { %2188 = vmatprep.subr.mxu0 %v3270_v5 }
0x1555   :  { %v1833_v0 = vpop.f32.mrf.mxu0 }
0x1556   :  { %v1840_v7 = vrot.slane %v1833_v0, 2 }
0x1557   :  { %v1835_v15 = vpop.f32.mrf.mxu0 }
0x1558   :  { %v1844_v34 = vadd.f32 %v1840_v7, %v3394_v4  ;;  %v1841_v25 = vrot.slane %v1835_v15, 2 }
0x155a   :  { %2614 = vtanh.f32 %v1844_v34  ;;  %v1845_v29 = vadd.f32 %v1841_v25, %v3400_v45  ;;  %v2284_v34 = vld [vmem:[#allocation13 + $0x38] sm:$0xff] }
0x155c   :  { %2616 = vtanh.f32 %v1845_v29  ;;  %v2283_v29 = vld [vmem:[#allocation13 + $0x30] sm:$0xff] }
0x1567   :  { %v2615_v21 = vpop.eup %2614 }
0x1568   :  { %v1848_v22 = vmul.f32 %v2615_v21, %v3066_v38  ;;  %v2282_v21 = vld [vmem:[#allocation13 + $0x28] sm:$0xff] }
0x1569   :  { %v2617_v2 = vpop.eup %2616 }
0x156a   :  { %v1849_v9 = vmul.f32 %v2617_v2, %v3069_v39  ;;  %v1850_v33 = vadd.f32 %v1848_v22, %v3072_v41  ;;  %v2281_v22 = vld [vmem:[#allocation13 + $0x20] sm:$0xff]  ;;  %v2280_v2 = vld [vmem:[#allocation13 + $0x18] sm:$0xff] }
0x156c   :  { %v1851_v5 = vadd.f32 %v1849_v9, %v3075_v42  ;;  %v1855_v35 = vmul.f32 %v1853_v23, %v1850_v33  ;;  %v2279_v23 = vld [vmem:[#allocation13 + $0x10] sm:$0xff]  ;;  %v2278_v9 = vld [vmem:[#allocation13 + $0x8] sm:$0xff] }
0x156e   :  { %v1856_v37 = vmul.f32 %v1851_v5, %v1850_v33  ;;  %v2277_v33 = vld [vmem:[#allocation13] sm:$0xff] }
0x1570   :  { %1858 = vrot.lane.b32.xlu1 %v1856_v37, %s2787_s1 }
0x15e2   :  { %v1859_v4 = vpop.permute.xlu1 %1858 }
0x15e3   :  { %v1861_v44 = vadd.f32 %v1859_v4, %v1855_v35 }
0x15e5   :  { %2618 = vtanh.f32 %v1861_v44  ;;  %v1950_v57 = vrot.slane %v1861_v44, 6 }
0x15f2   :  { %v2619_v45 = vpop.eup %2618 }
0x15f3   :  { %v1863_v47 = vmul.f32 %v2619_v45, %v1851_v5 }
0x15f5   :  { %v1865_v31 = vrot.slane %v1863_v47, 6 }
0x15f7   :  { %1866 = vrot.lane.b32.xlu0 %v1865_v31, %s2787_s1 }
0x1669   :  { %v1867_v49 = vpop.permute.xlu0 %1866 }
0x166a   :  { %2471 = vmatmul.mubr.msk.f32.vlgmr.msra.gmra.mxu1 %vm322_vm5, %v1867_v49 }
0x166b   :  { %2086 = vmatpush1.msra.mxu1 %v3278_v50  ;;  %2133 = vmatprep.mubr.f32.mxu1 %v2786_v1 }
0x166c   :  { %2087 = vmatprep.subr.mxu1 %v3280_v24 }
0x166d   :  { %2088 = vmatpush1.msra.mxu1 %v3283_v27 }
0x166e   :  { %2089 = vmatprep.subr.mxu1 %v3287_v6 }
0x166f   :  { %2090 = vmatpush1.msra.mxu1 %v3290_v8 }
0x1670   :  { %2091 = vmatprep.subr.mxu1 %v3294_v10 }
0x1671   :  { %2092 = vmatpush1.msra.mxu1 %v3297_v11 }
0x1672   :  { %2093 = vmatprep.subr.mxu1 %v3300_v12 }
0x1673   :  { %2094 = vmatpush1.msra.mxu1 %v3303_v13 }
0x1674   :  { %2095 = vmatprep.subr.mxu1 %v3306_v14 }
0x1675   :  { %2096 = vmatpush1.msra.mxu1 %v3309_v16 }
0x1676   :  { %2097 = vmatprep.subr.mxu1 %v3312_v17 }
0x1677   :  { %2098 = vmatpush1.msra.mxu1 %v3315_v18 }
0x1678   :  { %2099 = vmatprep.subr.mxu1 %v3318_v19 }
0x1679   :  { %2100 = vmatpush1.msra.mxu1 %v3321_v20 }
0x167a   :  { %2497 = vmatprep.subr.mxu1 %v2786_v1 }
0x172a   :  { %v1936_v32 = vpop.f32.mrf.mxu1 }
0x172b   :  { %v1941_v52 = vadd.f32 %v1936_v32, %v3386_v30 }
0x172c   :  { %v1938_v46 = vpop.f32.mrf.mxu1 }
0x172d   :  { %2620 = vtanh.f32 %v1941_v52  ;;  %v1942_v43 = vadd.f32 %v1938_v46, %v3391_v40 }
0x172f   :  { %2622 = vtanh.f32 %v1942_v43 }
0x173a   :  { %v2621_v54 = vpop.eup %2620 }
0x173b   :  { %v1945_v55 = vmul.f32 %v2621_v54, %v3066_v38 }
0x173c   :  { %v2623_v56 = vpop.eup %2622 }
0x173d   :  { %v1946_v3 = vmul.f32 %v2623_v56, %v3069_v39  ;;  %v1947_v51 = vadd.f32 %v1945_v55, %v3072_v41 }
0x173f   :  { %v1948_v48 = vadd.f32 %v1946_v3, %v3075_v42  ;;  %v1952_v53 = vmul.f32 %v1950_v57, %v1947_v51 }
0x1741   :  { %v1953_v26 = vmul.f32 %v1948_v48, %v1947_v51 }
0x1743   :  { %1955 = vrot.lane.b32.xlu1 %v1953_v26, %s2787_s1 }
0x17b5   :  { %v1956_v58 = vpop.permute.xlu1 %1955 }
0x17b6   :  { %v1958_v59 = vadd.f32 %v1956_v58, %v1952_v53 }
0x17b8   :  { %2624 = vtanh.f32 %v1958_v59 }
0x17c5   :  { %v2625_v36 = vpop.eup %2624 }
0x17c6   :  { %v1960_v60 = vmul.f32 %v2625_v36, %v1948_v48 }
0x17c8   :  { %1962 = vrot.lane.b32.xlu0 %v1960_v60, %s2787_s1 }
0x183a   :  { %v1963_v61 = vpop.permute.xlu0 %1962 }
0x183b   :  { %2472 = vmatmul.mubr.msk.f32.vlgmr.msra.gmra.mxu0 %vm322_vm5, %v1963_v61 }
0x183c   :  { %2189 = vmatpush1.msra.mxu0 %v3278_v50  ;;  %2236 = vmatprep.mubr.f32.mxu0 %v2786_v1 }
0x183d   :  { %2190 = vmatprep.subr.mxu0 %v3280_v24 }
0x183e   :  { %2191 = vmatpush1.msra.mxu0 %v3283_v27 }
0x183f   :  { %2192 = vmatprep.subr.mxu0 %v3287_v6 }
0x1840   :  { %2193 = vmatpush1.msra.mxu0 %v3290_v8 }
0x1841   :  { %2194 = vmatprep.subr.mxu0 %v3294_v10 }
0x1842   :  { %2195 = vmatpush1.msra.mxu0 %v3297_v11 }
0x1843   :  { %2196 = vmatprep.subr.mxu0 %v3300_v12 }
0x1844   :  { %2197 = vmatpush1.msra.mxu0 %v3303_v13 }
0x1845   :  { %2198 = vmatprep.subr.mxu0 %v3306_v14  ;;  %v2052_v14 = vrot.slane %v1958_v59, 6 }
0x1846   :  { %2199 = vmatpush1.msra.mxu0 %v3309_v16 }
0x1847   :  { %2200 = vmatprep.subr.mxu0 %v3312_v17 }
0x1848   :  { %2201 = vmatpush1.msra.mxu0 %v3315_v18 }
0x1849   :  { %2202 = vmatprep.subr.mxu0 %v3318_v19 }
0x184a   :  { %2203 = vmatpush1.msra.mxu0 %v3321_v20 }
0x184b   :  { %2516 = vmatprep.subr.mxu0 %v2786_v1 }
0x18fb   :  { %v2032_v50 = vpop.f32.mrf.mxu0 }
0x18fc   :  { %v2039_v24 = vrot.slane %v2032_v50, 6 }
0x18fd   :  { %v2034_v27 = vpop.f32.mrf.mxu0 }
0x18fe   :  { %v2043_v6 = vadd.f32 %v2039_v24, %v3386_v30  ;;  %v2040_v8 = vrot.slane %v2034_v27, 6 }
0x1900   :  { %2626 = vtanh.f32 %v2043_v6  ;;  %v2044_v10 = vadd.f32 %v2040_v8, %v3391_v40 }
0x1902   :  { %2628 = vtanh.f32 %v2044_v10 }
0x190d   :  { %v2627_v11 = vpop.eup %2626 }
0x190e   :  { %v2047_v12 = vmul.f32 %v2627_v11, %v3066_v38 }
0x190f   :  { %v2629_v13 = vpop.eup %2628 }
0x1910   :  { %v2048_v16 = vmul.f32 %v2629_v13, %v3069_v39  ;;  %v2049_v17 = vadd.f32 %v2047_v12, %v3072_v41 }
0x1912   :  { %v2050_v18 = vadd.f32 %v2048_v16, %v3075_v42  ;;  %v2054_v19 = vmul.f32 %v2052_v14, %v2049_v17  ;;  %v2275_v16 = vld [vmem:[#allocation12 + $0x30] sm:$0xff] }
0x1914   :  { %v2055_v20 = vmul.f32 %v2050_v18, %v2049_v17  ;;  %v2269_v17 = vld [vmem:[#allocation12] sm:$0xff] }
0x1916   :  { %2057 = vrot.lane.b32.xlu1 %v2055_v20, %s2787_s1 }
0x1988   :  { %v2058_v62 = vpop.permute.xlu1 %2057 }
0x1989   :  { %v2060_v63 = vadd.f32 %v2058_v62, %v2054_v19 }
0x198b   :  { %2630 = vtanh.f32 %v2060_v63  ;;  %v2155_v46 = vrot.slane %v2060_v63, 6 }
0x1998   :  { %v2631_v0 = vpop.eup %2630 }
0x1999   :  { %v2062_v7 = vmul.f32 %v2631_v0, %v2050_v18 }
0x199b   :  { %v2064_v15 = vrot.slane %v2062_v7, 2 }
0x199d   :  { %2065 = vrot.lane.b32.xlu0 %v2064_v15, %s2787_s1  ;;  %v2477_v15 = vld [vmem:[#allocation4] ss:$0 sm:$0xff] }
0x1a0f   :  { %v2066_v25 = vpop.permute.xlu0 %2065 }
0x1a10   :  { %2473 = vmatmul.mubr.msk.f32.vlgmr.msra.gmra.mxu1 %vm322_vm5, %v2066_v25 }
0x1a11   :  { %2498 = vmatpush3.msra.mxu1 %v2284_v34  ;;  %2513 = vmatprep.mubr.msk.f32.mxu1 %vm2788_vm9, %v2786_v1 }
0x1a12   :  { %2499 = vmatprep.subr.mxu1 %v2786_v1 }
0x1a13   :  { %2500 = vmatpush3.msra.mxu1 %v2283_v29 }
0x1a14   :  { %2501 = vmatprep.subr.mxu1 %v2786_v1 }
0x1a15   :  { %2502 = vmatpush3.msra.mxu1 %v2282_v21 }
0x1a16   :  { %2503 = vmatprep.subr.mxu1 %v2786_v1 }
0x1a17   :  { %2504 = vmatpush3.msra.mxu1 %v2281_v22 }
0x1a18   :  { %2505 = vmatprep.subr.mxu1 %v2786_v1 }
0x1a19   :  { %2506 = vmatpush3.msra.mxu1 %v2280_v2 }
0x1a1a   :  { %2507 = vmatprep.subr.mxu1 %v2786_v1 }
0x1a1b   :  { %2508 = vmatpush3.msra.mxu1 %v2279_v23 }
0x1a1c   :  { %2509 = vmatprep.subr.mxu1 %v2786_v1 }
0x1a1d   :  { %2510 = vmatpush3.msra.mxu1 %v2278_v9 }
0x1a1e   :  { %2511 = vmatprep.subr.mxu1 %v2786_v1 }
0x1a1f   :  { %2512 = vmatpush3.msra.mxu1 %v2277_v33 }
0x1a20   :  { %2514 = vmatmul.mubr.msk.f32.vlgmr.msra.gmra.mxu1 %vm322_vm5, %v3409_v28 }
0x1ad0   :  { %v2135_v5 = vpop.f32.mrf.mxu1 }
0x1ad1   :  { %v2142_v35 = vrot.slane %v2135_v5, 4 }
0x1ad2   :  { %v2137_v37 = vpop.f32.mrf.mxu1 }
0x1ad3   :  { %v2146_v4 = vadd.f32 %v2142_v35, %v3386_v30  ;;  %v2143_v44 = vrot.slane %v2137_v37, 4 }
0x1ad5   :  { %2632 = vtanh.f32 %v2146_v4  ;;  %v2147_v45 = vadd.f32 %v2143_v44, %v3391_v40 }
0x1ad7   :  { %2634 = vtanh.f32 %v2147_v45 }
0x1ae0   :  { %v3556_v47 = vpop.f32.mrf.mxu1 }
0x1ae2   :  { %v2633_v31 = vpop.eup %2632  ;;  %v2515_v49 = vpop.f32.mrf.mxu1 }
0x1ae3   :  { %v2150_v32 = vmul.f32 %v2633_v31, %v3066_v38 }
0x1ae4   :  { %v2635_v52 = vpop.eup %2634 }
0x1ae5   :  { %v2151_v28 = vmul.f32 %v2635_v52, %v3069_v39  ;;  %v2152_v43 = vadd.f32 %v2150_v32, %v3072_v41 }
0x1ae7   :  { %v2153_v54 = vadd.f32 %v2151_v28, %v3075_v42  ;;  %v2157_v55 = vmul.f32 %v2155_v46, %v2152_v43 }
0x1ae9   :  { %v2158_v56 = vmul.f32 %v2153_v54, %v2152_v43 }
0x1aeb   :  { %2160 = vrot.lane.b32.xlu1 %v2158_v56, %s2787_s1 }
0x1b5d   :  { %v2161_v57 = vpop.permute.xlu1 %2160 }
0x1b5e   :  { %v2163_v3 = vadd.f32 %v2161_v57, %v2157_v55 }
0x1b60   :  { %2636 = vtanh.f32 %v2163_v3  ;;  %v2258_v8 = vrot.slane %v2163_v3, 6 }
0x1b6d   :  { %v2637_v51 = vpop.eup %2636 }
0x1b6e   :  { %v2165_v48 = vmul.f32 %v2637_v51, %v2153_v54 }
0x1b70   :  { %v2167_v53 = vrot.slane %v2165_v48, 4 }
0x1b72   :  { %2168 = vrot.lane.b32.xlu0 %v2167_v53, %s2787_s1 }
0x1be4   :  { %v2169_v26 = vpop.permute.xlu0 %2168 }
0x1be5   :  { %2474 = vmatmul.mubr.msk.f32.vlgmr.msra.gmra.mxu0 %vm322_vm5, %v2169_v26 }
0x1be6   :  { %2532 = vmatprep.mubr.msk.f32.mxu0 %vm2788_vm9, %v2786_v1 }
0x1ca5   :  { %v2238_v58 = vpop.f32.mrf.mxu0 }
0x1ca6   :  { %v2245_v59 = vrot.slane %v2238_v58, 2 }
0x1ca7   :  { %v2240_v36 = vpop.f32.mrf.mxu0 }
0x1ca8   :  { %v2249_v60 = vadd.f32 %v2245_v59, %v3386_v30  ;;  %v2246_v61 = vrot.slane %v2240_v36, 2  ;;  %v2276_v30 = vld [vmem:[#allocation12 + $0x38] sm:$0xff] }
0x1ca9   :  { %2517 = vmatpush3.msra.mxu0 %v2276_v30 }
0x1caa   :  { %2638 = vtanh.f32 %v2249_v60  ;;  %v2250_v50 = vadd.f32 %v2246_v61, %v3391_v40  ;;  %2518 = vmatprep.subr.mxu0 %v2786_v1  ;;  %v2274_v40 = vld [vmem:[#allocation12 + $0x28] sm:$0xff] }
0x1cab   :  { %2519 = vmatpush3.msra.mxu0 %v2275_v16 }
0x1cac   :  { %2640 = vtanh.f32 %v2250_v50  ;;  %2520 = vmatprep.subr.mxu0 %v2786_v1 }
0x1cad   :  { %2521 = vmatpush3.msra.mxu0 %v2274_v40 }
0x1cae   :  { %2522 = vmatprep.subr.mxu0 %v2786_v1 }
0x1cb7   :  { %v2639_v24 = vpop.eup %2638 }
0x1cb8   :  { %v2253_v27 = vmul.f32 %v2639_v24, %v3066_v38  ;;  %v2273_v38 = vld [vmem:[#allocation12 + $0x20] sm:$0xff] }
0x1cb9   :  { %v2641_v6 = vpop.eup %2640  ;;  %2523 = vmatpush3.msra.mxu0 %v2273_v38 }
0x1cba   :  { %v2254_v10 = vmul.f32 %v2641_v6, %v3069_v39  ;;  %v2255_v11 = vadd.f32 %v2253_v27, %v3072_v41  ;;  %v2272_v39 = vld [vmem:[#allocation12 + $0x18] sm:$0xff]  ;;  %2524 = vmatprep.subr.mxu0 %v2786_v1  ;;  %v2271_v41 = vld [vmem:[#allocation12 + $0x10] sm:$0xff] }
0x1cbb   :  { %2525 = vmatpush3.msra.mxu0 %v2272_v39 }
0x1cbc   :  { %v2256_v12 = vadd.f32 %v2254_v10, %v3075_v42  ;;  %v2260_v13 = vmul.f32 %v2258_v8, %v2255_v11  ;;  %2526 = vmatprep.subr.mxu0 %v2786_v1  ;;  %v2270_v42 = vld [vmem:[#allocation12 + $0x8] sm:$0xff] }
0x1cbd   :  { %2527 = vmatpush3.msra.mxu0 %v2271_v41 }
0x1cbe   :  { %v2261_v14 = vmul.f32 %v2256_v12, %v2255_v11  ;;  %2528 = vmatprep.subr.mxu0 %v2786_v1 }
0x1cbf   :  { %2529 = vmatpush3.msra.mxu0 %v2270_v42 }
0x1cc0   :  { %2263 = vrot.lane.b32.xlu1 %v2261_v14, %s2787_s1  ;;  %2530 = vmatprep.subr.mxu0 %v2786_v1 }
0x1cc1   :  { %2531 = vmatpush3.msra.mxu0 %v2269_v17 }
0x1d32   :  { %v2264_v18 = vpop.permute.xlu1 %2263 }
0x1d33   :  { %v2266_v19 = vadd.f32 %v2264_v18, %v2260_v13 }
0x1d35   :  { %2642 = vtanh.f32 %v2266_v19 }
0x1d42   :  { %v2643_v20 = vpop.eup %2642 }
0x1d43   :  { %v2268_v62 = vmul.f32 %v2643_v20, %v2256_v12 }
0x1d45   :  { %v2356_v63 = vrot.slane %v2268_v62, 6 }
0x1d47   :  { %2357 = vrot.lane.b32.xlu0 %v2356_v63, %s2787_s1 }
0x1db9   :  { %v2358_v0 = vpop.permute.xlu0 %2357 }
0x1dba   :  { %2533 = vmatmul.mubr.msk.f32.vlgmr.msra.gmra.mxu0 %vm322_vm5, %v2358_v0 }
0x1e7a   :  { %v2427_v7 = vpop.f32.mrf.mxu0 }
0x1e7b   :  { %v2428_v34 = vadd.f32 %v2427_v7, %v3556_v47 }
0x1e7c   :  { %v2534_v25 = vpop.f32.mrf.mxu0 }
0x1e7d   :  { %v2438_v29 = vadd.f32 %v2477_v15, %v2428_v34 }
0x1e7f   :  { %v2478_v21 = vmul.f32 -1.442695, %v2438_v29 }
0x1e81   :  { %2644 = vpow2.f32 %v2478_v21 }
0x1e8e   :  { %v2645_v1 = vpop.eup %2644 }
0x1e8f   :  { %v2442_v22 = vadd.f32 1.0, %v2645_v1 }
0x1e91   :  { %2646 = vrcp.f32 %v2442_v22 }
0x1e9e   :  { %v2647_v2 = vpop.eup %2646 }
0x1e9f   :  { %2446 = vst.msk [vmem:[%s3601_s14] sm:$0x3] %vm2445_vm10, %v2647_v2 }
0x1ea0   :  { %2451 = vsyncpa [#allocation6], 1 }
0x1ea1   :  { %2452 = vsyncpa [#allocation8], 1 }
0x1ea2   :  { %2453 = vsyncpa [#allocation11], 1 }
0x1ea3   :  { %2454 = vsyncpa [#allocation14], 1 }

</bundles_post_ra>
